<compile_context>
chip_gen: v6e
topology: v6e:2x2x1
jax: 0.10.0
libtpu: 0.0.40
codegen_flags: <defaults>
</compile_context>

<pallas_src>
import numpy as np
import jax
import jax.numpy as jnp
from jax.experimental import pallas as pl
from jax.experimental.pallas import tpu as pltpu

N_CLASSES = 10
N_OUT_PAD = 128      # lane-dense output slab; sliced back to 10 in the wrapper


# ----------------------------------------------------------------------------
# Pallas kernel: full GNN forward for one batch tile
# ----------------------------------------------------------------------------
def gnn_kernel(x_ref, a_ref, w1_ref, b1_ref, w2_ref, b2_ref, w3_ref, b3_ref,
               wfc_ref, out_ref):
    f32, bf16 = jnp.float32, jnp.bfloat16
    n2 = a_ref.shape[0]

    a = a_ref[...]                                   # (N2, N2) bf16, symmetric
    x = x_ref[...].astype(bf16)                      # (TB, N2)

    # --- gconv1: graph step (C_in = 1) -> Linear(N2 -> 3*N2) -> ReLU --------
    # w1/b1 output columns were permuted in glue so z1 is CHANNEL-MAJOR:
    # column c*N2 + n  ==  torch flat index n*3 + c.
    ah1 = jnp.dot(x, a, preferred_element_type=f32)
    z1 = jnp.maximum(
        jnp.dot(ah1.astype(bf16), w1_ref[...], preferred_element_type=f32)
        + b1_ref[...], 0.0)                          # (TB, 3*N2) f32

    # --- gconv2: per-channel graph step (replaces kron(A, I_3)) -> Linear ---
    acc2 = jnp.zeros((x.shape[0], n2), dtype=f32)
    for c in range(3):                               # static unroll
        z1_c = z1[:, c * n2:(c + 1) * n2].astype(bf16)
        ah2_c = jnp.dot(z1_c, a, preferred_element_type=f32)
        acc2 = acc2 + jnp.dot(ah2_c.astype(bf16),
                              w2_ref[c * n2:(c + 1) * n2, :],
                              preferred_element_type=f32)
    z2 = jnp.maximum(acc2 + b2_ref[...], 0.0)        # (TB, N2)

    # --- gconv3: graph step -> Linear(N2 -> N2) -> ReLU ----------------------
    ah3 = jnp.dot(z2.astype(bf16), a, preferred_element_type=f32)
    z3 = jnp.maximum(
        jnp.dot(ah3.astype(bf16), w3_ref[...], preferred_element_type=f32)
        + b3_ref[...], 0.0)

    # --- fc: Linear(N2 -> 10), no bias, padded to 128 output lanes ----------
    out_ref[...] = jnp.dot(z3.astype(bf16), wfc_ref[...],
                           preferred_element_type=f32)


# ----------------------------------------------------------------------------
# Wrapper: batch tiling, resident weights, cost estimate
# ----------------------------------------------------------------------------
def _round_up(x, m):
    return (x + m - 1) // m * m


def gnn_forward(x_nchw, kernel_ops, *, max_tb=256):
    (A_b, w1p, b1p, w2p, b2, w3, b3, wfc_pad) = kernel_ops
    n2 = A_b.shape[0]
    B = x_nchw.shape[0]

    x_flat = x_nchw.reshape(B, -1).astype(jnp.float32)   # (B, N2) since C_in=1
    assert x_flat.shape[1] == n2

    # Batch tile: multiple of 8 sublanes, capped at 256 (MXU M fill on v6e/v7x),
    # small enough to sit far under v7x's 64 MiB VMEM with double-buffering.
    TB = min(max_tb, _round_up(B, 8))
    B_pad = _round_up(B, TB)
    if B_pad != B:
        x_flat = jnp.pad(x_flat, ((0, B_pad - B), (0, 0)))
    grid = (B_pad // TB,)

    def resident(shape):
        return pl.BlockSpec(shape, lambda i: (0, 0))

    flops = 2 * B_pad * (n2 * n2            # ah1
                         + n2 * 3 * n2      # w1
                         + 3 * n2 * n2      # ah2 (3 channels)
                         + 3 * n2 * n2      # w2
                         + n2 * n2          # ah3
                         + n2 * n2          # w3
                         + n2 * N_OUT_PAD)  # fc
    bytes_accessed = (int(x_flat.size) * 4 + B_pad * N_OUT_PAD * 4
                      + sum(int(np.prod(o.shape)) * o.dtype.itemsize
                            for o in (A_b, w1p, b1p, w2p, b2, w3, b3, wfc_pad)))

    out = pl.pallas_call(
        gnn_kernel,
        out_shape=jax.ShapeDtypeStruct((B_pad, N_OUT_PAD), jnp.float32),
        grid=grid,
        in_specs=[
            pl.BlockSpec((TB, n2), lambda i: (i, 0)),      # x (batch-tiled)
            resident((n2, n2)),                            # A            bf16
            resident((n2, 3 * n2)),                        # w1 (perm)    bf16
            resident((1, 3 * n2)),                         # b1 (perm)    f32
            resident((3 * n2, n2)),                        # w2 (perm)    bf16
            resident((1, n2)),                             # b2           f32
            resident((n2, n2)),                            # w3           bf16
            resident((1, n2)),                             # b3           f32
            resident((n2, N_OUT_PAD)),                     # fc (padded)  bf16
        ],
        out_specs=pl.BlockSpec((TB, N_OUT_PAD), lambda i: (i, 0)),
        compiler_params=pltpu.CompilerParams(
            dimension_semantics=("parallel",),
            vmem_limit_bytes=32 * 1024 * 1024),
        cost_estimate=pl.CostEstimate(flops=flops, transcendentals=0,
                                      bytes_accessed=bytes_accessed),
    )(x_flat, A_b, w1p, b1p, w2p, b2, w3, b3, wfc_pad)

    return out[:B, :N_CLASSES]


# ----------------------------------------------------------------------------
# Parameter construction (deterministic glue)
# ----------------------------------------------------------------------------
def adjacency_matrix_cross_connection(N):
    """Self + 4-neighbor (cross) adjacency, same as the PyTorch reference."""
    A = np.eye(N * N, dtype=np.float32)
    idx = np.arange(N * N).reshape(N, N)
    for i in range(N):
        for j in range(N):
            if j < N - 1:
                A[idx[i, j], idx[i, j + 1]] = 1.0
            if j > 0:
                A[idx[i, j], idx[i, j - 1]] = 1.0
            if i < N - 1:
                A[idx[i, j], idx[i + 1, j]] = 1.0
            if i > 0:
                A[idx[i, j], idx[i - 1, j]] = 1.0
    return jnp.asarray(A)


def init_linear(key, in_features, out_features, bias=True):
    """PyTorch-style uniform(-1/sqrt(in), 1/sqrt(in)) init, stored transposed."""
    bound = 1.0 / np.sqrt(in_features)
    kw, kb = jax.random.split(key)
    w_t = jax.random.uniform(kw, (in_features, out_features),
                             minval=-bound, maxval=bound, dtype=jnp.float32)
    if bias:
        b = jax.random.uniform(kb, (1, out_features),
                               minval=-bound, maxval=bound, dtype=jnp.float32)
        return w_t, b
    return w_t, None


def make_params(image_size=16, input_channels=1, seed=0):
    assert input_channels == 1, "reference GNN uses input_channels=1"
    N2 = image_size * image_size
    k1, k2, k3, k4 = jax.random.split(jax.random.PRNGKey(seed), 4)
    A = adjacency_matrix_cross_connection(image_size)
    w1t, b1 = init_linear(k1, N2 * 1, N2 * 3)        # gconv1 linear
    w2t, b2 = init_linear(k2, N2 * 3, N2 * 1)        # gconv2 linear
    w3t, b3 = init_linear(k3, N2 * 1, N2 * 1)        # gconv3 linear
    wfct, _ = init_linear(k4, N2 * 1, N_CLASSES, bias=False)   # fc (no bias)
    return (A, w1t, b1, w2t, b2, w3t, b3, wfct)


def prepare_kernel_operands(params):
    """Channel-major permutation of gconv1 outputs / gconv2 inputs (removes
    kron(A, I_3)), bf16 cast of A + weights, lane-pad the fc weight."""
    (A, w1t, b1, w2t, b2, w3t, b3, wfct) = params
    N2 = A.shape[0]
    # perm[c*N2 + n] = n*3 + c : torch-interleaved index -> channel-major
    perm = jnp.asarray(np.arange(3 * N2).reshape(N2, 3).T.reshape(-1))
    w1p = w1t[:, perm]
    b1p = b1[:, perm]
    w2p = w2t[perm, :]
    wfc_pad = jnp.zeros((N2, N_OUT_PAD), jnp.float32).at[:, :N_CLASSES].set(wfct)
    bf16 = jnp.bfloat16
    return (A.astype(bf16), w1p.astype(bf16), b1p,
            w2p.astype(bf16), b2, w3t.astype(bf16), b3, wfc_pad.astype(bf16))


# ----------------------------------------------------------------------------
# Pure-JAX f32 reference (mirrors the torch graph exactly)
# ----------------------------------------------------------------------------
def gnn_reference(x_nchw, params):
    (A, w1t, b1, w2t, b2, w3t, b3, wfct) = params
    B = x_nchw.shape[0]
    N2 = A.shape[0]

    def gconv(x_flat, in_c, w_t, b):
        h = x_flat.reshape(B, N2, in_c)                       # torch .view
        ah = jnp.einsum('nm,bmc->bnc', A, h).reshape(B, -1)   # bmm + flatten
        return jnp.maximum(ah @ w_t + b, 0.0)

    x = x_nchw.reshape(B, -1).astype(jnp.float32)
    x = gconv(x, 1, w1t, b1)
    x = gconv(x, 3, w2t, b2)
    x = gconv(x, 1, w3t, b3)
    return x @ wfct


if __name__ == "__main__":
    IMAGE_SIZE = 16
    B = 2
    params = make_params(image_size=IMAGE_SIZE, input_channels=1, seed=0)
    kernel_ops = prepare_kernel_operands(params)

    x = jax.random.normal(jax.random.PRNGKey(0),
                          (B, 1, IMAGE_SIZE, IMAGE_SIZE), dtype=jnp.float32)

    out = jax.block_until_ready(gnn_forward(x, kernel_ops))

    ref = gnn_reference(x, params)
    # Weights run in bf16 inside the kernel -> loosened tolerance vs. f32 ref.
    np.testing.assert_allclose(np.asarray(out), np.asarray(ref),
                               rtol=5e-2, atol=5e-2)
    assert out.shape == (B, N_CLASSES)
    print("KERNEL_OK")
</pallas_src>

<mosaic_0001>
module attributes {stable_mosaic.version = 11 : i64} {
  func.func @gnn_kernel(%arg0: i32, %arg1: memref<8x256xf32, #tpu.memory_space<vmem>>, %arg2: memref<256x256xbf16, #tpu.memory_space<vmem>>, %arg3: memref<256x768xbf16, #tpu.memory_space<vmem>>, %arg4: memref<1x768xf32, #tpu.memory_space<vmem>>, %arg5: memref<768x256xbf16, #tpu.memory_space<vmem>>, %arg6: memref<1x256xf32, #tpu.memory_space<vmem>>, %arg7: memref<256x256xbf16, #tpu.memory_space<vmem>>, %arg8: memref<1x256xf32, #tpu.memory_space<vmem>>, %arg9: memref<256x128xbf16, #tpu.memory_space<vmem>>, %arg10: memref<8x128xf32, #tpu.memory_space<vmem>>) attributes {dimension_semantics = [#tpu.dimension_semantics<parallel>], iteration_bounds = array<i64: 1>, scalar_prefetch = 0 : i64, scratch_operands = 0 : i64, tpu.core_type = #tpu.core_type<tc>, window_params = [{transform_indices = @transform_0, window_bounds = array<i64: 8, 256>}, {pipeline_mode = #tpu.pipeline_mode<synchronous>, transform_indices = @transform_1, window_bounds = array<i64: 256, 256>}, {pipeline_mode = #tpu.pipeline_mode<synchronous>, transform_indices = @transform_2, window_bounds = array<i64: 256, 768>}, {pipeline_mode = #tpu.pipeline_mode<synchronous>, transform_indices = @transform_3, window_bounds = array<i64: 1, 768>}, {pipeline_mode = #tpu.pipeline_mode<synchronous>, transform_indices = @transform_4, window_bounds = array<i64: 768, 256>}, {pipeline_mode = #tpu.pipeline_mode<synchronous>, transform_indices = @transform_5, window_bounds = array<i64: 1, 256>}, {pipeline_mode = #tpu.pipeline_mode<synchronous>, transform_indices = @transform_6, window_bounds = array<i64: 256, 256>}, {pipeline_mode = #tpu.pipeline_mode<synchronous>, transform_indices = @transform_7, window_bounds = array<i64: 1, 256>}, {pipeline_mode = #tpu.pipeline_mode<synchronous>, transform_indices = @transform_8, window_bounds = array<i64: 256, 128>}, {transform_indices = @transform_9, window_bounds = array<i64: 8, 128>}]} {
    %c0 = arith.constant 0 : index
    %c0_0 = arith.constant 0 : index
    %0 = vector.load %arg2[%c0, %c0_0] : memref<256x256xbf16, #tpu.memory_space<vmem>>, vector<256x256xbf16>
    %c0_1 = arith.constant 0 : index
    %c0_2 = arith.constant 0 : index
    %1 = vector.load %arg1[%c0_1, %c0_2] : memref<8x256xf32, #tpu.memory_space<vmem>>, vector<8x256xf32>
    %2 = arith.truncf %1 : vector<8x256xf32> to vector<8x256xbf16>
    %cst = arith.constant dense<0.000000e+00> : vector<8x256xf32>
    %3 = tpu.matmul %2, %0, %cst {dimension_numbers = #tpu.dot_dimension_numbers<[1], [0], [0], [1], [0, 0, 1, 1], [], []>} : vector<8x256xbf16>, vector<256x256xbf16>, vector<8x256xf32> -> vector<8x256xf32>
    %4 = arith.truncf %3 : vector<8x256xf32> to vector<8x256xbf16>
    %c0_3 = arith.constant 0 : index
    %c0_4 = arith.constant 0 : index
    %5 = vector.load %arg3[%c0_3, %c0_4] : memref<256x768xbf16, #tpu.memory_space<vmem>>, vector<256x768xbf16>
    %cst_5 = arith.constant dense<0.000000e+00> : vector<8x768xf32>
    %6 = tpu.matmul %4, %5, %cst_5 {dimension_numbers = #tpu.dot_dimension_numbers<[1], [0], [0], [1], [0, 0, 1, 1], [], []>} : vector<8x256xbf16>, vector<256x768xbf16>, vector<8x768xf32> -> vector<8x768xf32>
    %c0_6 = arith.constant 0 : index
    %c0_7 = arith.constant 0 : index
    %7 = vector.load %arg4[%c0_6, %c0_7] : memref<1x768xf32, #tpu.memory_space<vmem>>, vector<1x768xf32>
    %8 = vector.broadcast %7 : vector<1x768xf32> to vector<8x768xf32>
    %9 = arith.addf %6, %8 : vector<8x768xf32>
    %cst_8 = arith.constant 0.000000e+00 : f32
    %10 = vector.broadcast %cst_8 : f32 to vector<8x768xf32>
    %11 = arith.maximumf %9, %10 : vector<8x768xf32>
    %cst_9 = arith.constant 0.000000e+00 : f32
    %12 = vector.broadcast %cst_9 : f32 to vector<8x256xf32>
    %13 = vector.extract_strided_slice %11 {offsets = [0, 0], sizes = [8, 256], strides = [1, 1]} : vector<8x768xf32> to vector<8x256xf32>
    %14 = arith.truncf %13 : vector<8x256xf32> to vector<8x256xbf16>
    %cst_10 = arith.constant dense<0.000000e+00> : vector<8x256xf32>
    %15 = tpu.matmul %14, %0, %cst_10 {dimension_numbers = #tpu.dot_dimension_numbers<[1], [0], [0], [1], [0, 0, 1, 1], [], []>} : vector<8x256xbf16>, vector<256x256xbf16>, vector<8x256xf32> -> vector<8x256xf32>
    %16 = arith.truncf %15 : vector<8x256xf32> to vector<8x256xbf16>
    %c0_11 = arith.constant 0 : index
    %c0_12 = arith.constant 0 : index
    %17 = vector.load %arg5[%c0_11, %c0_12] : memref<768x256xbf16, #tpu.memory_space<vmem>>, vector<256x256xbf16>
    %cst_13 = arith.constant dense<0.000000e+00> : vector<8x256xf32>
    %18 = tpu.matmul %16, %17, %cst_13 {dimension_numbers = #tpu.dot_dimension_numbers<[1], [0], [0], [1], [0, 0, 1, 1], [], []>} : vector<8x256xbf16>, vector<256x256xbf16>, vector<8x256xf32> -> vector<8x256xf32>
    %19 = arith.addf %12, %18 : vector<8x256xf32>
    %20 = vector.extract_strided_slice %11 {offsets = [0, 256], sizes = [8, 256], strides = [1, 1]} : vector<8x768xf32> to vector<8x256xf32>
    %21 = arith.truncf %20 : vector<8x256xf32> to vector<8x256xbf16>
    %cst_14 = arith.constant dense<0.000000e+00> : vector<8x256xf32>
    %22 = tpu.matmul %21, %0, %cst_14 {dimension_numbers = #tpu.dot_dimension_numbers<[1], [0], [0], [1], [0, 0, 1, 1], [], []>} : vector<8x256xbf16>, vector<256x256xbf16>, vector<8x256xf32> -> vector<8x256xf32>
    %23 = arith.truncf %22 : vector<8x256xf32> to vector<8x256xbf16>
    %c256 = arith.constant 256 : index
    %c0_15 = arith.constant 0 : index
    %24 = vector.load %arg5[%c256, %c0_15] : memref<768x256xbf16, #tpu.memory_space<vmem>>, vector<256x256xbf16>
    %cst_16 = arith.constant dense<0.000000e+00> : vector<8x256xf32>
    %25 = tpu.matmul %23, %24, %cst_16 {dimension_numbers = #tpu.dot_dimension_numbers<[1], [0], [0], [1], [0, 0, 1, 1], [], []>} : vector<8x256xbf16>, vector<256x256xbf16>, vector<8x256xf32> -> vector<8x256xf32>
    %26 = arith.addf %19, %25 : vector<8x256xf32>
    %27 = vector.extract_strided_slice %11 {offsets = [0, 512], sizes = [8, 256], strides = [1, 1]} : vector<8x768xf32> to vector<8x256xf32>
    %28 = arith.truncf %27 : vector<8x256xf32> to vector<8x256xbf16>
    %cst_17 = arith.constant dense<0.000000e+00> : vector<8x256xf32>
    %29 = tpu.matmul %28, %0, %cst_17 {dimension_numbers = #tpu.dot_dimension_numbers<[1], [0], [0], [1], [0, 0, 1, 1], [], []>} : vector<8x256xbf16>, vector<256x256xbf16>, vector<8x256xf32> -> vector<8x256xf32>
    %30 = arith.truncf %29 : vector<8x256xf32> to vector<8x256xbf16>
    %c512 = arith.constant 512 : index
    %c0_18 = arith.constant 0 : index
    %31 = vector.load %arg5[%c512, %c0_18] : memref<768x256xbf16, #tpu.memory_space<vmem>>, vector<256x256xbf16>
    %cst_19 = arith.constant dense<0.000000e+00> : vector<8x256xf32>
    %32 = tpu.matmul %30, %31, %cst_19 {dimension_numbers = #tpu.dot_dimension_numbers<[1], [0], [0], [1], [0, 0, 1, 1], [], []>} : vector<8x256xbf16>, vector<256x256xbf16>, vector<8x256xf32> -> vector<8x256xf32>
    %33 = arith.addf %26, %32 : vector<8x256xf32>
    %c0_20 = arith.constant 0 : index
    %c0_21 = arith.constant 0 : index
    %34 = vector.load %arg6[%c0_20, %c0_21] : memref<1x256xf32, #tpu.memory_space<vmem>>, vector<1x256xf32>
    %35 = vector.broadcast %34 : vector<1x256xf32> to vector<8x256xf32>
    %36 = arith.addf %33, %35 : vector<8x256xf32>
    %cst_22 = arith.constant 0.000000e+00 : f32
    %37 = vector.broadcast %cst_22 : f32 to vector<8x256xf32>
    %38 = arith.maximumf %36, %37 : vector<8x256xf32>
    %39 = arith.truncf %38 : vector<8x256xf32> to vector<8x256xbf16>
    %cst_23 = arith.constant dense<0.000000e+00> : vector<8x256xf32>
    %40 = tpu.matmul %39, %0, %cst_23 {dimension_numbers = #tpu.dot_dimension_numbers<[1], [0], [0], [1], [0, 0, 1, 1], [], []>} : vector<8x256xbf16>, vector<256x256xbf16>, vector<8x256xf32> -> vector<8x256xf32>
    %41 = arith.truncf %40 : vector<8x256xf32> to vector<8x256xbf16>
    %c0_24 = arith.constant 0 : index
    %c0_25 = arith.constant 0 : index
    %42 = vector.load %arg7[%c0_24, %c0_25] : memref<256x256xbf16, #tpu.memory_space<vmem>>, vector<256x256xbf16>
    %cst_26 = arith.constant dense<0.000000e+00> : vector<8x256xf32>
    %43 = tpu.matmul %41, %42, %cst_26 {dimension_numbers = #tpu.dot_dimension_numbers<[1], [0], [0], [1], [0, 0, 1, 1], [], []>} : vector<8x256xbf16>, vector<256x256xbf16>, vector<8x256xf32> -> vector<8x256xf32>
    %c0_27 = arith.constant 0 : index
    %c0_28 = arith.constant 0 : index
    %44 = vector.load %arg8[%c0_27, %c0_28] : memref<1x256xf32, #tpu.memory_space<vmem>>, vector<1x256xf32>
    %45 = vector.broadcast %44 : vector<1x256xf32> to vector<8x256xf32>
    %46 = arith.addf %43, %45 : vector<8x256xf32>
    %cst_29 = arith.constant 0.000000e+00 : f32
    %47 = vector.broadcast %cst_29 : f32 to vector<8x256xf32>
    %48 = arith.maximumf %46, %47 : vector<8x256xf32>
    %49 = arith.truncf %48 : vector<8x256xf32> to vector<8x256xbf16>
    %c0_30 = arith.constant 0 : index
    %c0_31 = arith.constant 0 : index
    %50 = vector.load %arg9[%c0_30, %c0_31] : memref<256x128xbf16, #tpu.memory_space<vmem>>, vector<256x128xbf16>
    %cst_32 = arith.constant dense<0.000000e+00> : vector<8x128xf32>
    %51 = tpu.matmul %49, %50, %cst_32 {dimension_numbers = #tpu.dot_dimension_numbers<[1], [0], [0], [1], [0, 0, 1, 1], [], []>} : vector<8x256xbf16>, vector<256x128xbf16>, vector<8x128xf32> -> vector<8x128xf32>
    %c0_33 = arith.constant 0 : index
    %c0_34 = arith.constant 0 : index
    %52 = vector.load %arg10[%c0_33, %c0_34] : memref<8x128xf32, #tpu.memory_space<vmem>>, vector<8x128xf32>
    tpu.vector_store %arg10[%c0_33, %c0_34], %51 {strides = array<i32>} : memref<8x128xf32, #tpu.memory_space<vmem>>, vector<8x128xf32>,
    return
  }
  func.func @transform_0(%arg0: i32) -> (i32, i32) {
    %c0_i32 = arith.constant 0 : i32
    %c0_i32_0 = arith.constant 0 : i32
    return %arg0, %c0_i32 : i32, i32
  }
  func.func @transform_1(%arg0: i32) -> (i32, i32) {
    %c0_i32 = arith.constant 0 : i32
    %c0_i32_0 = arith.constant 0 : i32
    %c0_i32_1 = arith.constant 0 : i32
    return %c0_i32, %c0_i32_0 : i32, i32
  }
  func.func @transform_2(%arg0: i32) -> (i32, i32) {
    %c0_i32 = arith.constant 0 : i32
    %c0_i32_0 = arith.constant 0 : i32
    %c0_i32_1 = arith.constant 0 : i32
    return %c0_i32, %c0_i32_0 : i32, i32
  }
  func.func @transform_3(%arg0: i32) -> (i32, i32) {
    %c0_i32 = arith.constant 0 : i32
    %c0_i32_0 = arith.constant 0 : i32
    %c0_i32_1 = arith.constant 0 : i32
    return %c0_i32, %c0_i32_0 : i32, i32
  }
  func.func @transform_4(%arg0: i32) -> (i32, i32) {
    %c0_i32 = arith.constant 0 : i32
    %c0_i32_0 = arith.constant 0 : i32
    %c0_i32_1 = arith.constant 0 : i32
    return %c0_i32, %c0_i32_0 : i32, i32
  }
  func.func @transform_5(%arg0: i32) -> (i32, i32) {
    %c0_i32 = arith.constant 0 : i32
    %c0_i32_0 = arith.constant 0 : i32
    %c0_i32_1 = arith.constant 0 : i32
    return %c0_i32, %c0_i32_0 : i32, i32
  }
  func.func @transform_6(%arg0: i32) -> (i32, i32) {
    %c0_i32 = arith.constant 0 : i32
    %c0_i32_0 = arith.constant 0 : i32
    %c0_i32_1 = arith.constant 0 : i32
    return %c0_i32, %c0_i32_0 : i32, i32
  }
  func.func @transform_7(%arg0: i32) -> (i32, i32) {
    %c0_i32 = arith.constant 0 : i32
    %c0_i32_0 = arith.constant 0 : i32
    %c0_i32_1 = arith.constant 0 : i32
    return %c0_i32, %c0_i32_0 : i32, i32
  }
  func.func @transform_8(%arg0: i32) -> (i32, i32) {
    %c0_i32 = arith.constant 0 : i32
    %c0_i32_0 = arith.constant 0 : i32
    %c0_i32_1 = arith.constant 0 : i32
    return %c0_i32, %c0_i32_0 : i32, i32
  }
  func.func @transform_9(%arg0: i32) -> (i32, i32) {
    %c0_i32 = arith.constant 0 : i32
    %c0_i32_0 = arith.constant 0 : i32
    return %arg0, %c0_i32 : i32, i32
  }
}

</mosaic_0001>

<bundles_post_ra>
// kernel: tpu_custom_call.1
= control target key start
LH: loop header
LB: loop body
LE: loop exit
PB: predicated region body
PF: predicated region fallthrough
CT: control target
= control target key end

     0   :  { %14 = vsyncpa [#allocation3], 0  ;;  %s3775_s0 = inlined_call_operand.hbm [shape: f32[8,256], index: 0, kind: input, shape index: {}]   ;;  %s3776_s1 = inlined_call_operand.hbm [shape: bf16[256,256], index: 1, kind: input, shape index: {}]   ;;  %s3777_s2 = inlined_call_operand.hbm [shape: bf16[256,768], index: 2, kind: input, shape index: {}]   ;;  %s3778_s3 = inlined_call_operand.hbm [shape: f32[1,768], index: 3, kind: input, shape index: {}]   ;;  %s3779_s4 = inlined_call_operand.hbm [shape: bf16[768,256], index: 4, kind: input, shape index: {}]   ;;  %s3780_s5 = inlined_call_operand.vmem [shape: f32[1,256], index: 5, kind: input, shape index: {}]   ;;  %s3781_s6 = inlined_call_operand.hbm [shape: bf16[256,256], index: 6, kind: input, shape index: {}]   ;;  %s3782_s7 = inlined_call_operand.vmem [shape: f32[1,256], index: 7, kind: input, shape index: {}]   ;;  %s3783_s8 = inlined_call_operand.hbm [shape: bf16[256,128], index: 8, kind: input, shape index: {}]   ;;  %s3784_s9 = inlined_call_operand.hbm [shape: f32[8,128], index: 9, kind: output, shape index: {}]  }
   0x1   :  { %15 = vsyncpa [#allocation6], 0 }
   0x2   :  { %16 = vsyncpa [#allocation9], 0 }
   0x3   :  { %17 = vsyncpa [#allocation12], 0 }
   0x4   :  { %18 = vsyncpa [#allocation4], 0  ;;  %s3344_s30 = smov [#allocation5]  }
   0x5   :  { %s34_s10 = sshll.u32 %s3344_s30, 4  ;;  %s35_s10 = int_to_ptr.vmem [resolvable:$true] %s34_s10 }
   0x6   :  { %s3182_s11 = scalar_lea.vmem %s35_s10, 4096  ;;  %p3187_p1 = scmp.lt.s32.totalorder %s35_s10, %s35_s10 }
   0x7   :  { %p3183_p0 = scmp.ne.s32.totalorder %s35_s10, %s3182_s11  ;;  %p3188_p2 = scmp.lt.s32.totalorder %s3182_s11, %s3182_s11 }
   0x9   :  { %p3189_p3 = por %p3188_p2, %p3187_p1 }
   0xb   :  { %p3190_p4 = pnand %p3189_p3, %p3183_p0 }
   0xd   :  { %3193 = shalt.err (!%p3190_p4)
}
   0xe   :  { %s3345_s12 = smov 128   ;;  %s3346_s13 = smov 8  }
   0xf   :  { %40 = dma.hbm_to_vmem [thread:$0]  %s3776_s1, 4096, %s35_s10, [#allocation6], %s3345_s12, %s3345_s12, %s3346_s13  }
  0x10   :  { %s3347_s16 = smov [#allocation8]   ;;  %s3348_s18 = smov [#allocation11]  }
  0x11   :  { %s59_s17 = sshll.u32 %s3347_s16, 4  ;;  %s82_s19 = sshll.u32 %s3348_s18, 4  ;;  %s60_s17 = int_to_ptr.vmem [resolvable:$true] %s59_s17  ;;  %s83_s19 = int_to_ptr.vmem [resolvable:$true] %s82_s19 }
  0x12   :  { %s3202_s20 = scalar_lea.vmem %s60_s17, 96  ;;  %p3207_p6 = scmp.lt.s32.totalorder %s60_s17, %s60_s17 }
  0x13   :  { %p3203_p5 = scmp.ne.s32.totalorder %s60_s17, %s3202_s20  ;;  %p3208_p7 = scmp.lt.s32.totalorder %s3202_s20, %s3202_s20 }
  0x15   :  { %p3209_p8 = por %p3208_p7, %p3207_p6 }
  0x17   :  { %p3210_p9 = pnand %p3209_p8, %p3203_p5 }
  0x19   :  { %3213 = shalt.err (!%p3210_p9)
}
  0x1a   :  { %62 = dma.hbm_to_vmem [thread:$0]  %s3778_s3, 96, %s60_s17, [#allocation9]  }
  0x1b   :  { %s3222_s23 = scalar_lea.vmem %s83_s19, 4096  ;;  %p3227_p11 = scmp.lt.s32.totalorder %s83_s19, %s83_s19 }
  0x1c   :  { %p3223_p10 = scmp.ne.s32.totalorder %s83_s19, %s3222_s23  ;;  %p3228_p12 = scmp.lt.s32.totalorder %s3222_s23, %s3222_s23 }
  0x1e   :  { %p3229_p13 = por %p3228_p12, %p3227_p11 }
  0x20   :  { %p3230_p0 = pnand %p3229_p13, %p3223_p10 }
  0x22   :  { %3233 = shalt.err (!%p3230_p0)
}
  0x23   :  { %88 = dma.hbm_to_vmem [thread:$0]  %s3781_s6, 4096, %s83_s19, [#allocation12], %s3345_s12, %s3345_s12, %s3346_s13  }
  0x24   :  { %s3349_s25 = smov [#allocation2]   ;;  %s3350_s27 = smov [#allocation7]  }
  0x25   :  { %s25_s26 = sshll.u32 %s3349_s25, 4  ;;  %s46_s3 = sshll.u32 %s3350_s27, 4  ;;  %s26_s26 = int_to_ptr.vmem [resolvable:$true] %s25_s26  ;;  %s47_s3 = int_to_ptr.vmem [resolvable:$true] %s46_s3 }
  0x26   :  { %s3242_s28 = scalar_lea.vmem %s26_s26, 256  ;;  %p3247_p2 = scmp.lt.s32.totalorder %s26_s26, %s26_s26 }
  0x27   :  { %p3243_p1 = scmp.ne.s32.totalorder %s26_s26, %s3242_s28  ;;  %p3248_p3 = scmp.lt.s32.totalorder %s3242_s28, %s3242_s28 }
  0x29   :  { %p3249_p4 = por %p3248_p3, %p3247_p2 }
  0x2b   :  { %p3250_p5 = pnand %p3249_p4, %p3243_p1 }
  0x2d   :  { %3253 = shalt.err (!%p3250_p5)
}
  0x2e   :  { %28 = dma.hbm_to_vmem [thread:$0]  %s3775_s0, 256, %s26_s26, [#allocation3]  }
  0x2f   :  { %s3262_s10 = scalar_lea.vmem %s47_s3, 12288  ;;  %p3267_p7 = scmp.lt.s32.totalorder %s47_s3, %s47_s3 }
  0x30   :  { %p3263_p6 = scmp.ne.s32.totalorder %s47_s3, %s3262_s10  ;;  %p3268_p8 = scmp.lt.s32.totalorder %s3262_s10, %s3262_s10 }
  0x32   :  { %p3269_p9 = por %p3268_p8, %p3267_p7 }
  0x34   :  { %p3270_p10 = pnand %p3269_p9, %p3263_p6 }
  0x36   :  { %3273 = shalt.err (!%p3270_p10)
}
  0x37   :  { %s3351_s6 = smov 384   ;;  %s3352_s11 = smov 24  }
  0x38   :  { %52 = dma.hbm_to_vmem [thread:$0]  %s3777_s2, 12288, %s47_s3, [#allocation6], %s3351_s6, %s3351_s6, %s3352_s11  }
  0x39   :  { %s3353_s16 = smov [#allocation10]   ;;  %s3354_s18 = smov [#allocation13]  }
  0x3a   :  { %s68_s17 = sshll.u32 %s3353_s16, 4  ;;  %s96_s19 = sshll.u32 %s3354_s18, 4  ;;  %s69_s17 = int_to_ptr.vmem [resolvable:$true] %s68_s17  ;;  %s97_s19 = int_to_ptr.vmem [resolvable:$true] %s96_s19 }
  0x3b   :  { %s3282_s0 = scalar_lea.vmem %s69_s17, 12288  ;;  %p3287_p12 = scmp.lt.s32.totalorder %s69_s17, %s69_s17 }
  0x3c   :  { %p3283_p11 = scmp.ne.s32.totalorder %s69_s17, %s3282_s0  ;;  %p3288_p13 = scmp.lt.s32.totalorder %s3282_s0, %s3282_s0 }
  0x3e   :  { %p3289_p0 = por %p3288_p13, %p3287_p12 }
  0x40   :  { %p3290_p1 = pnand %p3289_p0, %p3283_p11 }
  0x42   :  { %3293 = shalt.err (!%p3290_p1)
}
  0x43   :  { %74 = dma.hbm_to_vmem [thread:$0]  %s3779_s4, 12288, %s69_s17, [#allocation9], %s3345_s12, %s3345_s12, %s3346_s13  }
  0x44   :  { %s3302_s2 = scalar_lea.vmem %s97_s19, 2048  ;;  %p3307_p3 = scmp.lt.s32.totalorder %s97_s19, %s97_s19 }
  0x45   :  { %p3303_p2 = scmp.ne.s32.totalorder %s97_s19, %s3302_s2  ;;  %p3308_p4 = scmp.lt.s32.totalorder %s3302_s2, %s3302_s2 }
  0x47   :  { %p3309_p5 = por %p3308_p4, %p3307_p3 }
  0x49   :  { %p3310_p6 = pnand %p3309_p5, %p3303_p2 }
  0x4b   :  { %3313 = shalt.err (!%p3310_p6)
}
  0x4c   :  { %s3355_s22 = smov 64   ;;  %s3356_s23 = smov 4  }
  0x4d   :  { %102 = dma.hbm_to_vmem [thread:$0]  %s3783_s8, 2048, %s97_s19, [#allocation12], %s3355_s22, %s3355_s22, %s3356_s23  }
  0x4e   :  { %3334 = dma.done.wait [#allocation3], 256  }
  0x4f   :  { %3335 = vsyncadd [#allocation3], 4294967040 }
  0x50   :  { %3336 = dma.done.wait [#allocation6], 16384  }
  0x51   :  { %3337 = vsyncadd [#allocation6], 4294950912 }
  0x52   :  { %3338 = dma.done.wait [#allocation9], 12384  }
  0x53   :  { %3339 = vsyncadd [#allocation9], 4294954912 }
  0x54   :  { %3340 = dma.done.wait [#allocation12], 6144  }
  0x55   :  { %3341 = vsyncadd [#allocation12], 4294961152  ;;  %v3438_v0 = vld [vmem:[#allocation5 + $0x74] ss:$8 sps:$4 sm:$0xff]   ;;  %v3440_v1 = vld [vmem:[#allocation5 + $0x70] ss:$8 sps:$4 sm:$0xff]  }
  0x56   :  { %321 = vmatprep.subr.bf16.mxu0 %v3438_v0  ;;  %v3443_v2 = vld [vmem:[#allocation5 + $0x64] ss:$8 sps:$4 sm:$0xff]   ;;  %v3446_v3 = vld [vmem:[#allocation5 + $0x60] ss:$8 sps:$4 sm:$0xff]   ;;  %v3449_v4 = vld [vmem:[#allocation5 + $0x54] ss:$8 sps:$4 sm:$0xff]  }
  0x57   :  { %322 = vmatpush1.bf16.msra.mxu0 %v3440_v1  ;;  %v3452_v5 = vld [vmem:[#allocation5 + $0x50] ss:$8 sps:$4 sm:$0xff]   ;;  %v3455_v6 = vld [vmem:[#allocation5 + $0x44] ss:$8 sps:$4 sm:$0xff]   ;;  %v3458_v7 = vld [vmem:[#allocation5 + $0x40] ss:$8 sps:$4 sm:$0xff]  }
  0x58   :  { %323 = vmatprep.subr.bf16.mxu0 %v3443_v2  ;;  %v3461_v8 = vld [vmem:[#allocation5 + $0x34] ss:$8 sps:$4 sm:$0xff]   ;;  %v3464_v9 = vld [vmem:[#allocation5 + $0x30] ss:$8 sps:$4 sm:$0xff]   ;;  %v3467_v10 = vld [vmem:[#allocation5 + $0x24] ss:$8 sps:$4 sm:$0xff]  }
  0x59   :  { %v3470_v11 = vld [vmem:[#allocation5 + $0x20] ss:$8 sps:$4 sm:$0xff]   ;;  %v3473_v12 = vld [vmem:[#allocation5 + $0x14] ss:$8 sps:$4 sm:$0xff]   ;;  %v3475_v13 = vld [vmem:[#allocation5 + $0x10] ss:$8 sps:$4 sm:$0xff]  }
  0x5a   :  { %v158_v14 = vld [vmem:[#allocation2 + $0x8] sm:$0xff]  ;;  %v2790_v16 = vld [vmem:[#allocation7 + $0x154] ss:$24 sps:$4 sm:$0xff]   ;;  %v2792_v17 = vld [vmem:[#allocation7 + $0x150] ss:$24 sps:$4 sm:$0xff]   ;;  %s3357_s13 = smov [#allocation14]  }
  0x5b   :  { %324 = vmatpush1.bf16.msra.mxu0 %v3446_v3  ;;  %v160_v15 = vpack.c.bf16 %v158_v14, %v158_v14  ;;  %v3479_v18 = vld [vmem:[#allocation5 + $0x4] ss:$8 sps:$4 sm:$0xff]   ;;  %972 = vmatprep.subr.bf16.mxu1 %v2790_v16  ;;  %v2798_v20 = vld [vmem:[#allocation7 + $0x120] ss:$24 sps:$4 sm:$0xff]   ;;  %v3485_v22 = vld [vmem:[#allocation5 + $0xf4] ss:$8 sps:$4 sm:$0xff]  }
  0x5c   :  { %325 = vmatprep.subr.bf16.mxu0 %v3449_v4  ;;  %v2796_v19 = vld [vmem:[#allocation7 + $0x124] ss:$24 sps:$4 sm:$0xff]   ;;  %973 = vmatpush1.bf16.msra.mxu1 %v2792_v17  ;;  %v3482_v21 = vld [vmem:[#allocation5] ss:$8 sps:$4 sm:$0xff]   ;;  %v2802_v23 = vld [vmem:[#allocation7 + $0xf4] ss:$24 sps:$4 sm:$0xff]  }
  0x5d   :  { %353 = vmatprep.mubr.bf16.mxu0 %v160_v15  ;;  %974 = vmatprep.subr.bf16.mxu1 %v2796_v19  ;;  %v3487_v24 = vld [vmem:[#allocation5 + $0xf0] ss:$8 sps:$4 sm:$0xff]   ;;  %v2808_v26 = vld [vmem:[#allocation7 + $0xc4] ss:$24 sps:$4 sm:$0xff]   ;;  %v3493_v28 = vld [vmem:[#allocation5 + $0xe0] ss:$8 sps:$4 sm:$0xff]  }
  0x5e   :  { %v2804_v25 = vld [vmem:[#allocation7 + $0xf0] ss:$24 sps:$4 sm:$0xff]   ;;  %v3491_v27 = vld [vmem:[#allocation5 + $0xe4] ss:$8 sps:$4 sm:$0xff]   ;;  %v2810_v29 = vld [vmem:[#allocation7 + $0xc0] ss:$24 sps:$4 sm:$0xff]  }
  0x5f   :  { %326 = vmatpush1.bf16.msra.mxu0 %v3452_v5  ;;  %v2814_v30 = vld [vmem:[#allocation7 + $0x94] ss:$24 sps:$4 sm:$0xff]   ;;  %v3499_v32 = vld [vmem:[#allocation5 + $0xd0] ss:$8 sps:$4 sm:$0xff]   ;;  %v2820_v34 = vld [vmem:[#allocation7 + $0x64] ss:$24 sps:$4 sm:$0xff]  }
  0x60   :  { %327 = vmatprep.subr.bf16.mxu0 %v3455_v6  ;;  %975 = vmatpush1.bf16.msra.mxu1 %v2798_v20  ;;  %v3497_v31 = vld [vmem:[#allocation5 + $0xd4] ss:$8 sps:$4 sm:$0xff]   ;;  %v2816_v33 = vld [vmem:[#allocation7 + $0x90] ss:$24 sps:$4 sm:$0xff]   ;;  %v3503_v35 = vld [vmem:[#allocation5 + $0xc4] ss:$8 sps:$4 sm:$0xff]  }
  0x61   :  { %976 = vmatprep.subr.bf16.mxu1 %v2802_v23  ;;  %v3505_v36 = vld [vmem:[#allocation5 + $0xc0] ss:$8 sps:$4 sm:$0xff]   ;;  %v2826_v38 = vld [vmem:[#allocation7 + $0x34] ss:$24 sps:$4 sm:$0xff]   ;;  %v3511_v40 = vld [vmem:[#allocation5 + $0xb0] ss:$8 sps:$4 sm:$0xff]  }
  0x62   :  { %v2822_v37 = vld [vmem:[#allocation7 + $0x60] ss:$24 sps:$4 sm:$0xff]   ;;  %v3509_v39 = vld [vmem:[#allocation5 + $0xb4] ss:$8 sps:$4 sm:$0xff]   ;;  %v2828_v41 = vld [vmem:[#allocation7 + $0x30] ss:$24 sps:$4 sm:$0xff]  }
  0x63   :  { %328 = vmatpush1.bf16.msra.mxu0 %v3458_v7  ;;  %v2832_v42 = vld [vmem:[#allocation7 + $0x4] ss:$24 sps:$4 sm:$0xff]   ;;  %v3517_v44 = vld [vmem:[#allocation5 + $0xa0] ss:$8 sps:$4 sm:$0xff]   ;;  %v2838_v46 = vld [vmem:[#allocation7 + $0x2d4] ss:$24 sps:$4 sm:$0xff]  }
  0x64   :  { %329 = vmatprep.subr.bf16.mxu0 %v3461_v8  ;;  %977 = vmatpush1.bf16.msra.mxu1 %v2804_v25  ;;  %v3515_v43 = vld [vmem:[#allocation5 + $0xa4] ss:$8 sps:$4 sm:$0xff]   ;;  %v2834_v45 = vld [vmem:[#allocation7] ss:$24 sps:$4 sm:$0xff]   ;;  %v3521_v47 = vld [vmem:[#allocation5 + $0x94] ss:$8 sps:$4 sm:$0xff]  }
  0x65   :  { %978 = vmatprep.subr.bf16.mxu1 %v2808_v26  ;;  %v3523_v48 = vld [vmem:[#allocation5 + $0x90] ss:$8 sps:$4 sm:$0xff]   ;;  %v2844_v50 = vld [vmem:[#allocation7 + $0x2a4] ss:$24 sps:$4 sm:$0xff]   ;;  %v3529_v52 = vld [vmem:[#allocation5 + $0x80] ss:$8 sps:$4 sm:$0xff]  }
  0x66   :  { %v2840_v49 = vld [vmem:[#allocation7 + $0x2d0] ss:$24 sps:$4 sm:$0xff]   ;;  %v3527_v51 = vld [vmem:[#allocation5 + $0x84] ss:$8 sps:$4 sm:$0xff]   ;;  %v2846_v54 = vld [vmem:[#allocation7 + $0x2a0] ss:$24 sps:$4 sm:$0xff]  }
  0x67   :  { %330 = vmatpush1.bf16.msra.mxu0 %v3464_v9  ;;  %v157_v53 = vld [vmem:[#allocation2] sm:$0xff]  ;;  %v2856_v59 = vld [vmem:[#allocation7 + $0x244] ss:$24 sps:$4 sm:$0xff]   ;;  %v2858_v62 = vld [vmem:[#allocation7 + $0x240] ss:$24 sps:$4 sm:$0xff]   ;;  %s2422_s25 = sshll.u32 %s3357_s13, 4  ;;  %s2423_s25 = int_to_ptr.vmem [resolvable:$true] %s2422_s25 }
  0x68   :  { %331 = vmatprep.subr.bf16.mxu0 %v3467_v10  ;;  %979 = vmatpush1.bf16.msra.mxu1 %v2810_v29  ;;  %v2850_v55 = vld [vmem:[#allocation7 + $0x274] ss:$24 sps:$4 sm:$0xff]   ;;  %v2793_v57 = vld [vmem:[#allocation7 + $0x158] ss:$24 sps:$4 sm:$0xff]   ;;  %v159_v60 = vpack.c.bf16 %v157_v53, %v157_v53  ;;  %v2799_v63 = vld [vmem:[#allocation7 + $0x128] ss:$24 sps:$4 sm:$0xff]   ;;  %p3319_p8 = scmp.lt.s32.totalorder %s2423_s25, %s2423_s25 }
  0x69   :  { %980 = vmatprep.subr.bf16.mxu1 %v2814_v30  ;;  %v2795_v56 = vld [vmem:[#allocation7 + $0x15c] ss:$24 sps:$4 sm:$0xff]   ;;  %v2852_v58 = vld [vmem:[#allocation7 + $0x270] ss:$24 sps:$4 sm:$0xff]   ;;  %v2801_v61 = vld [vmem:[#allocation7 + $0x12c] ss:$24 sps:$4 sm:$0xff]  }
  0x6a   :  { %v2862_v14 = vld [vmem:[#allocation7 + $0x214] ss:$24 sps:$4 sm:$0xff]   ;;  %v2864_v16 = vld [vmem:[#allocation7 + $0x210] ss:$24 sps:$4 sm:$0xff]   ;;  %v2868_v19 = vld [vmem:[#allocation7 + $0x1e4] ss:$24 sps:$4 sm:$0xff]  }
  0x6b   :  { %332 = vmatpush1.bf16.msra.mxu0 %v3470_v11  ;;  %v2807_v15 = vld [vmem:[#allocation7 + $0xfc] ss:$24 sps:$4 sm:$0xff]   ;;  %v2805_v17 = vld [vmem:[#allocation7 + $0xf8] ss:$24 sps:$4 sm:$0xff]   ;;  %v2813_v20 = vld [vmem:[#allocation7 + $0xcc] ss:$24 sps:$4 sm:$0xff]  }
  0x6c   :  { %333 = vmatprep.subr.bf16.mxu0 %v3473_v12  ;;  %981 = vmatpush1.bf16.msra.mxu1 %v2816_v33  ;;  %v2870_v23 = vld [vmem:[#allocation7 + $0x1e0] ss:$24 sps:$4 sm:$0xff]   ;;  %v2874_v26 = vld [vmem:[#allocation7 + $0x1b4] ss:$24 sps:$4 sm:$0xff]   ;;  %v2876_v30 = vld [vmem:[#allocation7 + $0x1b0] ss:$24 sps:$4 sm:$0xff]  }
  0x6d   :  { %982 = vmatprep.subr.bf16.mxu1 %v2820_v34  ;;  %v2811_v25 = vld [vmem:[#allocation7 + $0xc8] ss:$24 sps:$4 sm:$0xff]   ;;  %v2819_v29 = vld [vmem:[#allocation7 + $0x9c] ss:$24 sps:$4 sm:$0xff]   ;;  %v2817_v33 = vld [vmem:[#allocation7 + $0x98] ss:$24 sps:$4 sm:$0xff]  }
  0x6e   :  { %v2825_v34 = vld [vmem:[#allocation7 + $0x6c] ss:$24 sps:$4 sm:$0xff]   ;;  %v2847_v53 = vld [vmem:[#allocation7 + $0x2a8] ss:$24 sps:$4 sm:$0xff]  }
  0x6f   :  { %334 = vmatpush1.bf16.msra.mxu0 %v3475_v13 }
  0x70   :  { %335 = vmatprep.subr.bf16.mxu0 %v3479_v18  ;;  %983 = vmatpush1.bf16.msra.mxu1 %v2822_v37  ;;  %v2823_v37 = vld [vmem:[#allocation7 + $0x68] ss:$24 sps:$4 sm:$0xff]  }
  0x71   :  { %984 = vmatprep.subr.bf16.mxu1 %v2826_v38  ;;  %v2831_v38 = vld [vmem:[#allocation7 + $0x3c] ss:$24 sps:$4 sm:$0xff]  }
  0x73   :  { %336 = vmatpush1.bf16.msra.mxu0 %v3482_v21 }
  0x74   :  { %337 = vmatprep.subr.bf16.mxu0 %v3485_v22  ;;  %985 = vmatpush1.bf16.msra.mxu1 %v2828_v41  ;;  %v2829_v41 = vld [vmem:[#allocation7 + $0x38] ss:$24 sps:$4 sm:$0xff]  }
  0x75   :  { %986 = vmatprep.subr.bf16.mxu1 %v2832_v42  ;;  %v2837_v42 = vld [vmem:[#allocation7 + $0xc] ss:$24 sps:$4 sm:$0xff]  }
  0x77   :  { %338 = vmatpush2.bf16.msra.mxu0 %v3487_v24 }
  0x78   :  { %339 = vmatprep.subr.bf16.mxu0 %v3491_v27  ;;  %987 = vmatpush1.bf16.msra.mxu1 %v2834_v45  ;;  %v2835_v45 = vld [vmem:[#allocation7 + $0x8] ss:$24 sps:$4 sm:$0xff]  }
  0x79   :  { %988 = vmatprep.subr.bf16.mxu1 %v2838_v46  ;;  %v2843_v46 = vld [vmem:[#allocation7 + $0x2dc] ss:$24 sps:$4 sm:$0xff]  }
  0x7b   :  { %340 = vmatpush2.bf16.msra.mxu0 %v3493_v28 }
  0x7c   :  { %341 = vmatprep.subr.bf16.mxu0 %v3497_v31  ;;  %989 = vmatpush2.bf16.msra.mxu1 %v2840_v49  ;;  %v2841_v49 = vld [vmem:[#allocation7 + $0x2d8] ss:$24 sps:$4 sm:$0xff]  }
  0x7d   :  { %990 = vmatprep.subr.bf16.mxu1 %v2844_v50  ;;  %v2849_v50 = vld [vmem:[#allocation7 + $0x2ac] ss:$24 sps:$4 sm:$0xff]  }
  0x7f   :  { %342 = vmatpush2.bf16.msra.mxu0 %v3499_v32 }
  0x80   :  { %343 = vmatprep.subr.bf16.mxu0 %v3503_v35  ;;  %991 = vmatpush2.bf16.msra.mxu1 %v2846_v54  ;;  %v2855_v54 = vld [vmem:[#allocation7 + $0x27c] ss:$24 sps:$4 sm:$0xff]  }
  0x81   :  { %992 = vmatprep.subr.bf16.mxu1 %v2850_v55  ;;  %v2853_v55 = vld [vmem:[#allocation7 + $0x278] ss:$24 sps:$4 sm:$0xff]  }
  0x83   :  { %344 = vmatpush2.bf16.msra.mxu0 %v3505_v36 }
  0x84   :  { %345 = vmatprep.subr.bf16.mxu0 %v3509_v39  ;;  %993 = vmatpush2.bf16.msra.mxu1 %v2852_v58  ;;  %v2867_v58 = vld [vmem:[#allocation7 + $0x21c] ss:$24 sps:$4 sm:$0xff]  }
  0x85   :  { %994 = vmatprep.subr.bf16.mxu1 %v2856_v59  ;;  %v2865_v59 = vld [vmem:[#allocation7 + $0x218] ss:$24 sps:$4 sm:$0xff]  }
  0x87   :  { %346 = vmatpush2.bf16.msra.mxu0 %v3511_v40 }
  0x88   :  { %347 = vmatprep.subr.bf16.mxu0 %v3515_v43  ;;  %995 = vmatpush2.bf16.msra.mxu1 %v2858_v62  ;;  %v2879_v62 = vld [vmem:[#allocation7 + $0x1bc] ss:$24 sps:$4 sm:$0xff]  }
  0x89   :  { %996 = vmatprep.subr.bf16.mxu1 %v2862_v14  ;;  %v2880_v14 = vld [vmem:[#allocation7 + $0x184] ss:$24 sps:$4 sm:$0xff]  }
  0x8b   :  { %348 = vmatpush2.bf16.msra.mxu0 %v3517_v44 }
  0x8c   :  { %349 = vmatprep.subr.bf16.mxu0 %v3521_v47  ;;  %997 = vmatpush2.bf16.msra.mxu1 %v2864_v16  ;;  %v2885_v16 = vld [vmem:[#allocation7 + $0x18c] ss:$24 sps:$4 sm:$0xff]  }
  0x8d   :  { %998 = vmatprep.subr.bf16.mxu1 %v2868_v19  ;;  %v2888_v19 = vld [vmem:[#allocation7 + $0x164] ss:$24 sps:$4 sm:$0xff]  }
  0x8f   :  { %350 = vmatpush2.bf16.msra.mxu0 %v3523_v48 }
  0x90   :  { %351 = vmatprep.subr.bf16.mxu0 %v3527_v51  ;;  %999 = vmatpush2.bf16.msra.mxu1 %v2870_v23 }
  0x91   :  { %1000 = vmatprep.subr.bf16.mxu1 %v2874_v26  ;;  %v2886_v26 = vld [vmem:[#allocation7 + $0x160] ss:$24 sps:$4 sm:$0xff]  }
  0x93   :  { %352 = vmatpush2.bf16.msra.mxu0 %v3529_v52 }
  0x94   :  { %1013 = vmatprep.subr.bf16.mxu0 %v2795_v56  ;;  %1001 = vmatpush2.bf16.msra.mxu1 %v2876_v30  ;;  %v2861_v56 = vld [vmem:[#allocation7 + $0x24c] ss:$24 sps:$4 sm:$0xff]  }
  0x95   :  { %1002 = vmatprep.subr.bf16.mxu1 %v2880_v14  ;;  %v3601_v14 = vld [vmem:[#allocation5 + $0x24] ss:$8 sps:$4 sm:$0xff]  }
  0x96   :  { %354 = vmatmul.mubr.bf16.vlgmr.msra.gmra.mxu0 %v159_v60  ;;  %v2873_v60 = vld [vmem:[#allocation7 + $0x1ec] ss:$24 sps:$4 sm:$0xff]  }
  0x97   :  { %1014 = vmatpush1.bf16.msra.mxu0 %v2793_v57  ;;  %v2859_v57 = vld [vmem:[#allocation7 + $0x248] ss:$24 sps:$4 sm:$0xff]  }
  0x98   :  { %1015 = vmatprep.subr.bf16.mxu0 %v2801_v61  ;;  %v2871_v61 = vld [vmem:[#allocation7 + $0x1e8] ss:$24 sps:$4 sm:$0xff]  }
  0x9b   :  { %1016 = vmatpush1.bf16.msra.mxu0 %v2799_v63  ;;  %v2877_v63 = vld [vmem:[#allocation7 + $0x1b8] ss:$24 sps:$4 sm:$0xff]  }
  0x9c   :  { %1017 = vmatprep.subr.bf16.mxu0 %v2807_v15  ;;  %v2882_v15 = vld [vmem:[#allocation7 + $0x180] ss:$24 sps:$4 sm:$0xff]  }
  0x9d   :  { %1003 = vmatpush2.bf16.msra.mxu1 %v2882_v15  ;;  %v3604_v15 = vld [vmem:[#allocation5 + $0x20] ss:$8 sps:$4 sm:$0xff]  }
  0x9e   :  { %1054 = vmatprep.subr.bf16.mxu1 %v2888_v19  ;;  %v3613_v19 = vld [vmem:[#allocation5 + $0x4] ss:$8 sps:$4 sm:$0xff]  }
  0x9f   :  { %1018 = vmatpush1.bf16.msra.mxu0 %v2805_v17  ;;  %v2883_v17 = vld [vmem:[#allocation7 + $0x188] ss:$24 sps:$4 sm:$0xff]  }
  0xa0   :  { %1019 = vmatprep.subr.bf16.mxu0 %v2813_v20 }
  0xa3   :  { %1020 = vmatpush1.bf16.msra.mxu0 %v2811_v25 }
  0xa4   :  { %1021 = vmatprep.subr.bf16.mxu0 %v2819_v29 }
  0xa7   :  { %1022 = vmatpush1.bf16.msra.mxu0 %v2817_v33  ;;  %v2891_v33 = vld [vmem:[#allocation7 + $0x134] ss:$24 sps:$4 sm:$0xff]  }
  0xa8   :  { %1023 = vmatprep.subr.bf16.mxu0 %v2825_v34 }
  0xab   :  { %1024 = vmatpush1.bf16.msra.mxu0 %v2823_v37  ;;  %v2889_v37 = vld [vmem:[#allocation7 + $0x130] ss:$24 sps:$4 sm:$0xff]  }
  0xac   :  { %1025 = vmatprep.subr.bf16.mxu0 %v2831_v38  ;;  %v2892_v38 = vld [vmem:[#allocation7 + $0x100] ss:$24 sps:$4 sm:$0xff]  }
  0xaf   :  { %1026 = vmatpush1.bf16.msra.mxu0 %v2829_v41  ;;  %v2897_v41 = vld [vmem:[#allocation7 + $0xd4] ss:$24 sps:$4 sm:$0xff]  }
  0xb0   :  { %1027 = vmatprep.subr.bf16.mxu0 %v2837_v42  ;;  %v2895_v42 = vld [vmem:[#allocation7 + $0xd0] ss:$24 sps:$4 sm:$0xff]  }
  0xb3   :  { %1028 = vmatpush1.bf16.msra.mxu0 %v2835_v45  ;;  %v2900_v45 = vld [vmem:[#allocation7 + $0xa4] ss:$24 sps:$4 sm:$0xff]  }
  0xb4   :  { %1029 = vmatprep.subr.bf16.mxu0 %v2843_v46  ;;  %v2930_v46 = vld [vmem:[#allocation7 + $0x1c4] ss:$24 sps:$4 sm:$0xff]  }
  0xb7   :  { %1030 = vmatpush2.bf16.msra.mxu0 %v2841_v49  ;;  %v2928_v49 = vld [vmem:[#allocation7 + $0x1c0] ss:$24 sps:$4 sm:$0xff]  }
  0xb8   :  { %1031 = vmatprep.subr.bf16.mxu0 %v2849_v50  ;;  %v2933_v50 = vld [vmem:[#allocation7 + $0x194] ss:$24 sps:$4 sm:$0xff]  }
  0xbb   :  { %1032 = vmatpush2.bf16.msra.mxu0 %v2847_v53  ;;  %v2931_v53 = vld [vmem:[#allocation7 + $0x190] ss:$24 sps:$4 sm:$0xff]  }
  0xbc   :  { %1033 = vmatprep.subr.bf16.mxu0 %v2855_v54  ;;  %v3569_v54 = vld [vmem:[#allocation5 + $0x74] ss:$8 sps:$4 sm:$0xff]  }
  0xbf   :  { %1034 = vmatpush2.bf16.msra.mxu0 %v2853_v55  ;;  %v3574_v55 = vld [vmem:[#allocation5 + $0x70] ss:$8 sps:$4 sm:$0xff]  }
  0xc0   :  { %1035 = vmatprep.subr.bf16.mxu0 %v2861_v56  ;;  %v3577_v56 = vld [vmem:[#allocation5 + $0x64] ss:$8 sps:$4 sm:$0xff]  }
  0xc3   :  { %1036 = vmatpush2.bf16.msra.mxu0 %v2859_v57  ;;  %v3580_v57 = vld [vmem:[#allocation5 + $0x60] ss:$8 sps:$4 sm:$0xff]  }
  0xc4   :  { %1037 = vmatprep.subr.bf16.mxu0 %v2867_v58  ;;  %v3583_v58 = vld [vmem:[#allocation5 + $0x54] ss:$8 sps:$4 sm:$0xff]  }
  0xc7   :  { %1038 = vmatpush2.bf16.msra.mxu0 %v2865_v59  ;;  %v3586_v59 = vld [vmem:[#allocation5 + $0x50] ss:$8 sps:$4 sm:$0xff]  }
  0xc8   :  { %1039 = vmatprep.subr.bf16.mxu0 %v2873_v60  ;;  %v3589_v60 = vld [vmem:[#allocation5 + $0x44] ss:$8 sps:$4 sm:$0xff]  }
  0xcb   :  { %1040 = vmatpush2.bf16.msra.mxu0 %v2871_v61  ;;  %v3592_v61 = vld [vmem:[#allocation5 + $0x40] ss:$8 sps:$4 sm:$0xff]  }
  0xcc   :  { %1041 = vmatprep.subr.bf16.mxu0 %v2879_v62  ;;  %v3595_v62 = vld [vmem:[#allocation5 + $0x34] ss:$8 sps:$4 sm:$0xff]  }
  0xcf   :  { %1042 = vmatpush2.bf16.msra.mxu0 %v2877_v63  ;;  %v3598_v63 = vld [vmem:[#allocation5 + $0x30] ss:$8 sps:$4 sm:$0xff]  }
  0xd0   :  { %1043 = vmatprep.subr.bf16.mxu0 %v2885_v16  ;;  %v3607_v16 = vld [vmem:[#allocation5 + $0x14] ss:$8 sps:$4 sm:$0xff]  }
  0xd3   :  { %1044 = vmatpush2.bf16.msra.mxu0 %v2883_v17  ;;  %v3610_v17 = vld [vmem:[#allocation5 + $0x10] ss:$8 sps:$4 sm:$0xff]  }
  0xd4   :  { %1103 = vmatprep.subr.bf16.mxu0 %v3438_v0  ;;  %v2894_v0 = vld [vmem:[#allocation7 + $0x104] ss:$24 sps:$4 sm:$0xff]  }
 0x156   :  { %v355_v20 = vpop.f32.mrf.mxu0 }
 0x157   :  { %v3535_v29 = vpack.c.bf16 %v355_v20, %v355_v20  ;;  %v3616_v20 = vld [vmem:[#allocation5] ss:$8 sps:$4 sm:$0xff]  }
 0x158   :  { %v357_v23 = vpop.f32.mrf.mxu0 }
 0x159   :  { %v363_v25 = vpack.c.bf16 %v357_v23, %v357_v23  ;;  %v3619_v23 = vld [vmem:[#allocation5 + $0xf4] ss:$8 sps:$4 sm:$0xff]  }
 0x15a   :  { %v359_v30 = vpop.f32.mrf.mxu0 }
 0x15b   :  { %1004 = vmatprep.mubr.bf16.mxu1 %v363_v25  ;;  %1045 = vmatprep.mubr.bf16.mxu0 %v363_v25 }
 0x15c   :  { %v360_v34 = vpop.f32.mrf.mxu0  ;;  %1005 = vmatmul.mubr.bf16.vlgmr.msra.gmra.mxu1 %v3535_v29  ;;  %1046 = vmatmul.mubr.bf16.vlgmr.msra.gmra.mxu0 %v3535_v29 }
 0x15d   :  { %1055 = vmatpush1.bf16.msra.mxu1 %v2886_v26  ;;  %1086 = vmatprep.mubr.bf16.mxu1 %v363_v25  ;;  %v3622_v25 = vld [vmem:[#allocation5 + $0xf0] ss:$8 sps:$4 sm:$0xff]   ;;  %v3625_v26 = vld [vmem:[#allocation5 + $0xe4] ss:$8 sps:$4 sm:$0xff]  }
 0x15e   :  { %1056 = vmatprep.subr.bf16.mxu1 %v2891_v33  ;;  %1104 = vmatpush1.bf16.msra.mxu0 %v3440_v1  ;;  %v2898_v1 = vld [vmem:[#allocation7 + $0xa0] ss:$24 sps:$4 sm:$0xff]  }
 0x15f   :  { %1105 = vmatprep.subr.bf16.mxu0 %v3443_v2  ;;  %v2903_v2 = vld [vmem:[#allocation7 + $0x74] ss:$24 sps:$4 sm:$0xff]  }
 0x161   :  { %1057 = vmatpush1.bf16.msra.mxu1 %v2889_v37 }
 0x162   :  { %1058 = vmatprep.subr.bf16.mxu1 %v2894_v0  ;;  %1106 = vmatpush1.bf16.msra.mxu0 %v3446_v3  ;;  %v2901_v3 = vld [vmem:[#allocation7 + $0x70] ss:$24 sps:$4 sm:$0xff]  }
 0x163   :  { %1107 = vmatprep.subr.bf16.mxu0 %v3449_v4  ;;  %v2906_v4 = vld [vmem:[#allocation7 + $0x44] ss:$24 sps:$4 sm:$0xff]  }
 0x165   :  { %1059 = vmatpush1.bf16.msra.mxu1 %v2892_v38 }
 0x166   :  { %1060 = vmatprep.subr.bf16.mxu1 %v2897_v41  ;;  %1108 = vmatpush1.bf16.msra.mxu0 %v3452_v5  ;;  %v2904_v5 = vld [vmem:[#allocation7 + $0x40] ss:$24 sps:$4 sm:$0xff]  }
 0x167   :  { %1109 = vmatprep.subr.bf16.mxu0 %v3455_v6  ;;  %v2909_v6 = vld [vmem:[#allocation7 + $0x14] ss:$24 sps:$4 sm:$0xff]  }
 0x169   :  { %1061 = vmatpush1.bf16.msra.mxu1 %v2895_v42 }
 0x16a   :  { %1062 = vmatprep.subr.bf16.mxu1 %v2900_v45  ;;  %1110 = vmatpush1.bf16.msra.mxu0 %v3458_v7  ;;  %v2907_v7 = vld [vmem:[#allocation7 + $0x10] ss:$24 sps:$4 sm:$0xff]  }
 0x16b   :  { %1111 = vmatprep.subr.bf16.mxu0 %v3461_v8  ;;  %v2912_v8 = vld [vmem:[#allocation7 + $0x2e4] ss:$24 sps:$4 sm:$0xff]  }
 0x16d   :  { %1063 = vmatpush1.bf16.msra.mxu1 %v2898_v1 }
 0x16e   :  { %1064 = vmatprep.subr.bf16.mxu1 %v2903_v2  ;;  %1112 = vmatpush1.bf16.msra.mxu0 %v3464_v9  ;;  %v2910_v9 = vld [vmem:[#allocation7 + $0x2e0] ss:$24 sps:$4 sm:$0xff]  }
 0x16f   :  { %1113 = vmatprep.subr.bf16.mxu0 %v3467_v10  ;;  %v2915_v10 = vld [vmem:[#allocation7 + $0x2b4] ss:$24 sps:$4 sm:$0xff]  }
 0x171   :  { %1065 = vmatpush1.bf16.msra.mxu1 %v2901_v3 }
 0x172   :  { %1066 = vmatprep.subr.bf16.mxu1 %v2906_v4  ;;  %1114 = vmatpush1.bf16.msra.mxu0 %v3470_v11  ;;  %v2913_v11 = vld [vmem:[#allocation7 + $0x2b0] ss:$24 sps:$4 sm:$0xff]  }
 0x173   :  { %1115 = vmatprep.subr.bf16.mxu0 %v3473_v12  ;;  %v2918_v12 = vld [vmem:[#allocation7 + $0x284] ss:$24 sps:$4 sm:$0xff]  }
 0x175   :  { %1067 = vmatpush1.bf16.msra.mxu1 %v2904_v5 }
 0x176   :  { %1068 = vmatprep.subr.bf16.mxu1 %v2909_v6  ;;  %1116 = vmatpush1.bf16.msra.mxu0 %v3475_v13  ;;  %v2916_v13 = vld [vmem:[#allocation7 + $0x280] ss:$24 sps:$4 sm:$0xff]  }
 0x177   :  { %1117 = vmatprep.subr.bf16.mxu0 %v3479_v18  ;;  %v2921_v18 = vld [vmem:[#allocation7 + $0x254] ss:$24 sps:$4 sm:$0xff]  }
 0x179   :  { %1069 = vmatpush1.bf16.msra.mxu1 %v2907_v7 }
 0x17a   :  { %1070 = vmatprep.subr.bf16.mxu1 %v2912_v8  ;;  %1118 = vmatpush1.bf16.msra.mxu0 %v3482_v21  ;;  %v2919_v21 = vld [vmem:[#allocation7 + $0x250] ss:$24 sps:$4 sm:$0xff]  }
 0x17b   :  { %1119 = vmatprep.subr.bf16.mxu0 %v3485_v22  ;;  %v2924_v22 = vld [vmem:[#allocation7 + $0x224] ss:$24 sps:$4 sm:$0xff]  }
 0x17d   :  { %1071 = vmatpush2.bf16.msra.mxu1 %v2910_v9 }
 0x17e   :  { %1072 = vmatprep.subr.bf16.mxu1 %v2915_v10  ;;  %1120 = vmatpush2.bf16.msra.mxu0 %v3487_v24  ;;  %v2922_v24 = vld [vmem:[#allocation7 + $0x220] ss:$24 sps:$4 sm:$0xff]  }
 0x17f   :  { %1121 = vmatprep.subr.bf16.mxu0 %v3491_v27  ;;  %v2927_v27 = vld [vmem:[#allocation7 + $0x1f4] ss:$24 sps:$4 sm:$0xff]  }
 0x181   :  { %1073 = vmatpush2.bf16.msra.mxu1 %v2913_v11  ;;  %v2934_v11 = vld [vmem:[#allocation10 + $0x170] ss:$8 sps:$4 sm:$0xff]  }
 0x182   :  { %1074 = vmatprep.subr.bf16.mxu1 %v2918_v12  ;;  %1122 = vmatpush2.bf16.msra.mxu0 %v3493_v28  ;;  %v2925_v28 = vld [vmem:[#allocation7 + $0x1f0] ss:$24 sps:$4 sm:$0xff]   ;;  %v2937_v12 = vld [vmem:[#allocation10 + $0x70] ss:$8 sps:$4 sm:$0xff]  }
 0x183   :  { %1123 = vmatprep.subr.bf16.mxu0 %v3497_v31 }
 0x185   :  { %1075 = vmatpush2.bf16.msra.mxu1 %v2916_v13 }
 0x186   :  { %1076 = vmatprep.subr.bf16.mxu1 %v2921_v18  ;;  %1124 = vmatpush2.bf16.msra.mxu0 %v3499_v32 }
 0x187   :  { %1125 = vmatprep.subr.bf16.mxu0 %v3503_v35 }
 0x189   :  { %1077 = vmatpush2.bf16.msra.mxu1 %v2919_v21  ;;  %v2942_v21 = vld [vmem:[#allocation10 + $0x164] ss:$8 sps:$4 sm:$0xff]  }
 0x18a   :  { %1078 = vmatprep.subr.bf16.mxu1 %v2924_v22  ;;  %1126 = vmatpush2.bf16.msra.mxu0 %v3505_v36  ;;  %v2945_v22 = vld [vmem:[#allocation10 + $0x64] ss:$8 sps:$4 sm:$0xff]  }
 0x18b   :  { %1127 = vmatprep.subr.bf16.mxu0 %v3509_v39 }
 0x18d   :  { %1079 = vmatpush2.bf16.msra.mxu1 %v2922_v24  ;;  %v2940_v24 = vld [vmem:[#allocation10 + $0x160] ss:$8 sps:$4 sm:$0xff]  }
 0x18e   :  { %1080 = vmatprep.subr.bf16.mxu1 %v2927_v27  ;;  %1128 = vmatpush2.bf16.msra.mxu0 %v3511_v40  ;;  %v2943_v27 = vld [vmem:[#allocation10 + $0x60] ss:$8 sps:$4 sm:$0xff]  }
 0x18f   :  { %1129 = vmatprep.subr.bf16.mxu0 %v3515_v43 }
 0x191   :  { %1081 = vmatpush2.bf16.msra.mxu1 %v2925_v28  ;;  %v2948_v28 = vld [vmem:[#allocation10 + $0x154] ss:$8 sps:$4 sm:$0xff]  }
 0x192   :  { %1082 = vmatprep.subr.bf16.mxu1 %v2930_v46  ;;  %1130 = vmatpush2.bf16.msra.mxu0 %v3517_v44  ;;  %v2951_v46 = vld [vmem:[#allocation10 + $0x54] ss:$8 sps:$4 sm:$0xff]  }
 0x193   :  { %1131 = vmatprep.subr.bf16.mxu0 %v3521_v47 }
 0x195   :  { %1083 = vmatpush2.bf16.msra.mxu1 %v2928_v49  ;;  %v2946_v49 = vld [vmem:[#allocation10 + $0x150] ss:$8 sps:$4 sm:$0xff]  }
 0x196   :  { %1084 = vmatprep.subr.bf16.mxu1 %v2933_v50  ;;  %1132 = vmatpush2.bf16.msra.mxu0 %v3523_v48  ;;  %v2949_v50 = vld [vmem:[#allocation10 + $0x50] ss:$8 sps:$4 sm:$0xff]  }
 0x197   :  { %1133 = vmatprep.subr.bf16.mxu0 %v3527_v51 }
 0x199   :  { %1085 = vmatpush2.bf16.msra.mxu1 %v2931_v53  ;;  %v2954_v53 = vld [vmem:[#allocation10 + $0x144] ss:$8 sps:$4 sm:$0xff]  }
 0x19a   :  { %1180 = vmatprep.subr.bf16.mxu1 %v3569_v54  ;;  %1134 = vmatpush2.bf16.msra.mxu0 %v3529_v52 }
 0x19c   :  { %1087 = vmatmul.mubr.bf16.vlgmr.msra.gmra.mxu1 %v3535_v29  ;;  %v3628_v29 = vld [vmem:[#allocation5 + $0xe0] ss:$8 sps:$4 sm:$0xff]  }
 0x19d   :  { %1181 = vmatpush1.bf16.msra.mxu1 %v3574_v55 }
 0x19e   :  { %1182 = vmatprep.subr.bf16.mxu1 %v3577_v56 }
 0x1a1   :  { %1183 = vmatpush1.bf16.msra.mxu1 %v3580_v57 }
 0x1a2   :  { %1184 = vmatprep.subr.bf16.mxu1 %v3583_v58 }
 0x1a5   :  { %1185 = vmatpush1.bf16.msra.mxu1 %v3586_v59 }
 0x1a6   :  { %1186 = vmatprep.subr.bf16.mxu1 %v3589_v60 }
 0x1a9   :  { %1187 = vmatpush1.bf16.msra.mxu1 %v3592_v61 }
 0x1aa   :  { %1188 = vmatprep.subr.bf16.mxu1 %v3595_v62 }
 0x1ad   :  { %1189 = vmatpush1.bf16.msra.mxu1 %v3598_v63 }
 0x1ae   :  { %1190 = vmatprep.subr.bf16.mxu1 %v3601_v14 }
 0x1b1   :  { %1191 = vmatpush1.bf16.msra.mxu1 %v3604_v15 }
 0x1b2   :  { %1192 = vmatprep.subr.bf16.mxu1 %v3607_v16 }
 0x1b5   :  { %1193 = vmatpush1.bf16.msra.mxu1 %v3610_v17 }
 0x1b6   :  { %1194 = vmatprep.subr.bf16.mxu1 %v3613_v19 }
 0x1b9   :  { %1195 = vmatpush1.bf16.msra.mxu1 %v3616_v20 }
 0x1ba   :  { %1196 = vmatprep.subr.bf16.mxu1 %v3619_v23 }
 0x1bd   :  { %1197 = vmatpush2.bf16.msra.mxu1 %v3622_v25 }
 0x1be   :  { %1198 = vmatprep.subr.bf16.mxu1 %v3625_v26 }
 0x1c1   :  { %1199 = vmatpush2.bf16.msra.mxu1 %v3628_v29 }
 0x1c2   :  { %1200 = vmatprep.subr.bf16.mxu1 %v3497_v31  ;;  %v2936_v31 = vld [vmem:[#allocation10 + $0x174] ss:$8 sps:$4 sm:$0xff]  }
 0x1c3   :  { %1415 = vmatprep.subr.bf16.mxu0 %v2936_v31  ;;  %v2957_v31 = vld [vmem:[#allocation10 + $0x44] ss:$8 sps:$4 sm:$0xff]  }
 0x1c5   :  { %1201 = vmatpush2.bf16.msra.mxu1 %v3499_v32  ;;  %v2939_v32 = vld [vmem:[#allocation10 + $0x74] ss:$8 sps:$4 sm:$0xff]  }
 0x1c6   :  { %1202 = vmatprep.subr.bf16.mxu1 %v3503_v35  ;;  %v462_v35 = vlaneseq }
 0x1c9   :  { %1203 = vmatpush2.bf16.msra.mxu1 %v3505_v36  ;;  %v3643_v36 = vshrl.u32 %v462_v35, 7  ;;  %v2955_v35 = vld [vmem:[#allocation10 + $0x40] ss:$8 sps:$4 sm:$0xff]  }
 0x1ca   :  { %1204 = vmatprep.subr.bf16.mxu1 %v3509_v39 }
 0x1cb   :  { %v3646_v39 = vsub.s32 0, %v3643_v36 }
 0x1cd   :  { %1205 = vmatpush2.bf16.msra.mxu1 %v3511_v40  ;;  %v472_v40 = vsub.s32 2, %v3643_v36 }
 0x1ce   :  { %1206 = vmatprep.subr.bf16.mxu1 %v3515_v43  ;;  %v3649_v43 = vld [vmem:[#allocation8] sm:$0x3f] }
 0x1d1   :  { %1207 = vmatpush2.bf16.msra.mxu1 %v3517_v44  ;;  %v3652_v44 = vsub.s32 1, %v3643_v36 }
 0x1d2   :  { %1208 = vmatprep.subr.bf16.mxu1 %v3521_v47  ;;  %v476_v47 = vsub.s32 3, %v3643_v36 }
 0x1d4   :  { %v477_v30 = vrot.slane %v3649_v43, %v476_v47  ;;  %v2963_v47 = vld [vmem:[#allocation10 + $0x34] ss:$8 sps:$4 sm:$0xff]  }
 0x1d5   :  { %1209 = vmatpush2.bf16.msra.mxu1 %v3523_v48  ;;  %v465_v48 = vrot.slane %v3649_v43, %v3646_v39 }
 0x1d6   :  { %1210 = vmatprep.subr.bf16.mxu1 %v3527_v51  ;;  %v473_v51 = vrot.slane %v3649_v43, %v472_v40  ;;  %v2960_v40 = vld [vmem:[#allocation10 + $0x134] ss:$8 sps:$4 sm:$0xff]  }
 0x1d9   :  { %1211 = vmatpush2.bf16.msra.mxu1 %v3529_v52  ;;  %v469_v52 = vrot.slane %v3649_v43, %v3652_v44 }
 0x1da   :  { %1616 = vmatprep.subr.bf16.mxu1 %v2939_v32  ;;  %v2952_v32 = vld [vmem:[#allocation10 + $0x140] ss:$8 sps:$4 sm:$0xff]  }
 0x21c   :  { %v1006_v33 = vpop.f32.mrf.mxu1  ;;  %v1047_v34 = vpop.f32.mrf.mxu0 }
 0x21d   :  { %v1007_v37 = vadd.f32 %v1006_v33, %v465_v48  ;;  %v1048_v0 = vadd.f32 %v1047_v34, %v473_v51  ;;  %v2958_v48 = vld [vmem:[#allocation10 + $0x130] ss:$8 sps:$4 sm:$0xff]   ;;  %v2964_v33 = vld [vmem:[#allocation10 + $0x120] ss:$8 sps:$4 sm:$0xff]  }
 0x21e   :  { %v1008_v38 = vpop.f32.mrf.mxu1  ;;  %v1049_v41 = vpop.f32.mrf.mxu0  ;;  %v2961_v51 = vld [vmem:[#allocation10 + $0x30] ss:$8 sps:$4 sm:$0xff]   ;;  %v2967_v34 = vld [vmem:[#allocation10 + $0x20] ss:$8 sps:$4 sm:$0xff]  }
 0x21f   :  { %v1009_v42 = vadd.f32 %v1008_v38, %v469_v52  ;;  %v1050_v45 = vadd.f32 %v1049_v41, %v477_v30  ;;  %v1095_v1 = vmax.f32 %v1007_v37, 0.0  ;;  %v1097_v2 = vmax.f32 %v1048_v0, 0.0  ;;  %v2966_v52 = vld [vmem:[#allocation10 + $0x124] ss:$8 sps:$4 sm:$0xff]   ;;  %v2972_v37 = vld [vmem:[#allocation10 + $0x114] ss:$8 sps:$4 sm:$0xff]  }
 0x220   :  { %v1010_v3 = vpop.f32.mrf.mxu1  ;;  %v1051_v4 = vpop.f32.mrf.mxu0  ;;  %v2969_v30 = vld [vmem:[#allocation10 + $0x24] ss:$8 sps:$4 sm:$0xff]   ;;  %v2975_v0 = vld [vmem:[#allocation10 + $0x14] ss:$8 sps:$4 sm:$0xff]   ;;  %v2970_v38 = vld [vmem:[#allocation10 + $0x110] ss:$8 sps:$4 sm:$0xff]  }
 0x221   :  { %v1096_v5 = vmax.f32 %v1009_v42, 0.0  ;;  %v1098_v6 = vmax.f32 %v1050_v45, 0.0  ;;  %v1101_v13 = vpack.c.bf16 %v1095_v1, %v1095_v1  ;;  %v1178_v18 = vpack.c.bf16 %v1097_v2, %v1097_v2  ;;  %v2973_v41 = vld [vmem:[#allocation10 + $0x10] ss:$8 sps:$4 sm:$0xff]   ;;  %v2978_v42 = vld [vmem:[#allocation10 + $0x104] ss:$8 sps:$4 sm:$0xff]  }
 0x222   :  { %v1011_v7 = vpop.f32.mrf.mxu1  ;;  %v1052_v8 = vpop.f32.mrf.mxu0  ;;  %v2981_v45 = vld [vmem:[#allocation10 + $0x4] ss:$8 sps:$4 sm:$0xff]   ;;  %v2976_v1 = vld [vmem:[#allocation10 + $0x100] ss:$8 sps:$4 sm:$0xff]   ;;  %v2984_v3 = vld [vmem:[#allocation10 + $0x1f4] ss:$8 sps:$4 sm:$0xff]  }
 0x223   :  { %v1102_v9 = vpack.c.bf16 %v1096_v5, %v1096_v5  ;;  %v1179_v10 = vpack.c.bf16 %v1098_v6, %v1098_v6  ;;  %v2979_v2 = vld [vmem:[#allocation10] ss:$8 sps:$4 sm:$0xff]   ;;  %v2987_v4 = vld [vmem:[#allocation10 + $0xf4] ss:$8 sps:$4 sm:$0xff]   ;;  %v2982_v5 = vld [vmem:[#allocation10 + $0x1f0] ss:$8 sps:$4 sm:$0xff]  }
 0x224   :  { %v2985_v6 = vld [vmem:[#allocation10 + $0xf0] ss:$8 sps:$4 sm:$0xff]   ;;  %v2990_v7 = vld [vmem:[#allocation10 + $0x1e4] ss:$8 sps:$4 sm:$0xff]  }
 0x225   :  { %1135 = vmatprep.mubr.bf16.mxu0 %v1102_v9  ;;  %1212 = vmatprep.mubr.bf16.mxu1 %v1179_v10  ;;  %v2993_v8 = vld [vmem:[#allocation10 + $0xe4] ss:$8 sps:$4 sm:$0xff]   ;;  %v2988_v9 = vld [vmem:[#allocation10 + $0x1e0] ss:$8 sps:$4 sm:$0xff]  }
 0x226   :  { %1136 = vmatmul.mubr.bf16.vlgmr.msra.gmra.mxu0 %v1101_v13  ;;  %1213 = vmatmul.mubr.bf16.vlgmr.msra.gmra.mxu1 %v1178_v18  ;;  %v2991_v10 = vld [vmem:[#allocation10 + $0xe0] ss:$8 sps:$4 sm:$0xff]   ;;  %v2994_v13 = vld [vmem:[#allocation10 + $0x1d0] ss:$8 sps:$4 sm:$0xff]  }
 0x227   :  { %1416 = vmatpush1.bf16.msra.mxu0 %v2934_v11  ;;  %1617 = vmatpush1.bf16.msra.mxu1 %v2937_v12  ;;  %v2996_v11 = vld [vmem:[#allocation10 + $0x1d4] ss:$8 sps:$4 sm:$0xff]   ;;  %v2997_v18 = vld [vmem:[#allocation10 + $0xd0] ss:$8 sps:$4 sm:$0xff]  }
 0x228   :  { %1417 = vmatprep.subr.bf16.mxu0 %v2942_v21  ;;  %1618 = vmatprep.subr.bf16.mxu1 %v2945_v22  ;;  %v2999_v12 = vld [vmem:[#allocation10 + $0xd4] ss:$8 sps:$4 sm:$0xff]   ;;  %v3002_v21 = vld [vmem:[#allocation10 + $0x1c4] ss:$8 sps:$4 sm:$0xff]  }
 0x229   :  { %v3005_v22 = vld [vmem:[#allocation10 + $0xc4] ss:$8 sps:$4 sm:$0xff]  }
 0x22b   :  { %1418 = vmatpush1.bf16.msra.mxu0 %v2940_v24  ;;  %1619 = vmatpush1.bf16.msra.mxu1 %v2943_v27  ;;  %v3000_v24 = vld [vmem:[#allocation10 + $0x1c0] ss:$8 sps:$4 sm:$0xff]  }
 0x22c   :  { %1419 = vmatprep.subr.bf16.mxu0 %v2948_v28  ;;  %1620 = vmatprep.subr.bf16.mxu1 %v2951_v46  ;;  %v3003_v27 = vld [vmem:[#allocation10 + $0xc0] ss:$8 sps:$4 sm:$0xff]   ;;  %v3008_v28 = vld [vmem:[#allocation10 + $0x1b4] ss:$8 sps:$4 sm:$0xff]  }
 0x22d   :  { %v3011_v46 = vld [vmem:[#allocation10 + $0xb4] ss:$8 sps:$4 sm:$0xff]  }
 0x22f   :  { %1420 = vmatpush1.bf16.msra.mxu0 %v2946_v49  ;;  %1621 = vmatpush1.bf16.msra.mxu1 %v2949_v50  ;;  %v3006_v49 = vld [vmem:[#allocation10 + $0x1b0] ss:$8 sps:$4 sm:$0xff]  }
 0x230   :  { %1421 = vmatprep.subr.bf16.mxu0 %v2954_v53  ;;  %1622 = vmatprep.subr.bf16.mxu1 %v2957_v31  ;;  %v3009_v50 = vld [vmem:[#allocation10 + $0xb0] ss:$8 sps:$4 sm:$0xff]   ;;  %v3014_v53 = vld [vmem:[#allocation10 + $0x1a4] ss:$8 sps:$4 sm:$0xff]  }
 0x231   :  { %v3017_v31 = vld [vmem:[#allocation10 + $0xa4] ss:$8 sps:$4 sm:$0xff]  }
 0x233   :  { %1422 = vmatpush1.bf16.msra.mxu0 %v2952_v32  ;;  %1623 = vmatpush1.bf16.msra.mxu1 %v2955_v35  ;;  %v3012_v32 = vld [vmem:[#allocation10 + $0x1a0] ss:$8 sps:$4 sm:$0xff]  }
 0x234   :  { %1423 = vmatprep.subr.bf16.mxu0 %v2960_v40  ;;  %1624 = vmatprep.subr.bf16.mxu1 %v2963_v47  ;;  %v3015_v35 = vld [vmem:[#allocation10 + $0xa0] ss:$8 sps:$4 sm:$0xff]   ;;  %v3020_v40 = vld [vmem:[#allocation10 + $0x194] ss:$8 sps:$4 sm:$0xff]  }
 0x235   :  { %v3023_v47 = vld [vmem:[#allocation10 + $0x94] ss:$8 sps:$4 sm:$0xff]  }
 0x237   :  { %1424 = vmatpush1.bf16.msra.mxu0 %v2958_v48  ;;  %1625 = vmatpush1.bf16.msra.mxu1 %v2961_v51  ;;  %v3018_v48 = vld [vmem:[#allocation10 + $0x190] ss:$8 sps:$4 sm:$0xff]  }
 0x238   :  { %1425 = vmatprep.subr.bf16.mxu0 %v2966_v52  ;;  %1626 = vmatprep.subr.bf16.mxu1 %v2969_v30  ;;  %v3021_v51 = vld [vmem:[#allocation10 + $0x90] ss:$8 sps:$4 sm:$0xff]  }
 0x23b   :  { %1426 = vmatpush1.bf16.msra.mxu0 %v2964_v33  ;;  %1627 = vmatpush1.bf16.msra.mxu1 %v2967_v34 }
 0x23c   :  { %1427 = vmatprep.subr.bf16.mxu0 %v2972_v37  ;;  %1628 = vmatprep.subr.bf16.mxu1 %v2975_v0  ;;  %v3026_v37 = vld [vmem:[#allocation10 + $0x184] ss:$8 sps:$4 sm:$0xff]   ;;  %v3024_v0 = vld [vmem:[#allocation10 + $0x180] ss:$8 sps:$4 sm:$0xff]  }
 0x23f   :  { %1428 = vmatpush1.bf16.msra.mxu0 %v2970_v38  ;;  %1629 = vmatpush1.bf16.msra.mxu1 %v2973_v41  ;;  %v3029_v38 = vld [vmem:[#allocation10 + $0x84] ss:$8 sps:$4 sm:$0xff]   ;;  %v3027_v41 = vld [vmem:[#allocation10 + $0x80] ss:$8 sps:$4 sm:$0xff]  }
 0x240   :  { %1429 = vmatprep.subr.bf16.mxu0 %v2978_v42  ;;  %1630 = vmatprep.subr.bf16.mxu1 %v2981_v45  ;;  %v484_v42 = vsub.s32 5, %v3643_v36 }
 0x242   :  { %v485_v45 = vrot.slane %v3649_v43, %v484_v42  ;;  %v3074_v42 = vld [vmem:[#allocation10 + $0x294] ss:$8 sps:$4 sm:$0xff]  }
 0x243   :  { %1430 = vmatpush1.bf16.msra.mxu0 %v2976_v1  ;;  %1631 = vmatpush1.bf16.msra.mxu1 %v2979_v2 }
 0x244   :  { %1431 = vmatprep.subr.bf16.mxu0 %v2984_v3  ;;  %1632 = vmatprep.subr.bf16.mxu1 %v2987_v4 }
 0x247   :  { %1432 = vmatpush2.bf16.msra.mxu0 %v2982_v5  ;;  %1633 = vmatpush2.bf16.msra.mxu1 %v2985_v6 }
 0x248   :  { %1433 = vmatprep.subr.bf16.mxu0 %v2990_v7  ;;  %1634 = vmatprep.subr.bf16.mxu1 %v2993_v8 }
 0x24b   :  { %1434 = vmatpush2.bf16.msra.mxu0 %v2988_v9  ;;  %1635 = vmatpush2.bf16.msra.mxu1 %v2991_v10 }
 0x24c   :  { %1435 = vmatprep.subr.bf16.mxu0 %v2996_v11  ;;  %1636 = vmatprep.subr.bf16.mxu1 %v2999_v12 }
 0x24f   :  { %1436 = vmatpush2.bf16.msra.mxu0 %v2994_v13  ;;  %1637 = vmatpush2.bf16.msra.mxu1 %v2997_v18 }
 0x250   :  { %1437 = vmatprep.subr.bf16.mxu0 %v3002_v21  ;;  %1638 = vmatprep.subr.bf16.mxu1 %v3005_v22  ;;  %v3685_v22 = vld [vmem:[#allocation5 + $0xd4] ss:$8 sps:$4 sm:$0xff]  }
 0x253   :  { %1438 = vmatpush2.bf16.msra.mxu0 %v3000_v24  ;;  %1639 = vmatpush2.bf16.msra.mxu1 %v3003_v27  ;;  %v3688_v24 = vld [vmem:[#allocation5 + $0xd0] ss:$8 sps:$4 sm:$0xff]   ;;  %v3691_v27 = vld [vmem:[#allocation5 + $0xc4] ss:$8 sps:$4 sm:$0xff]  }
 0x254   :  { %1439 = vmatprep.subr.bf16.mxu0 %v3008_v28  ;;  %1640 = vmatprep.subr.bf16.mxu1 %v3011_v46  ;;  %v3694_v28 = vld [vmem:[#allocation5 + $0xc0] ss:$8 sps:$4 sm:$0xff]   ;;  %v480_v46 = vsub.s32 4, %v3643_v36 }
 0x257   :  { %1440 = vmatpush2.bf16.msra.mxu0 %v3006_v49  ;;  %1641 = vmatpush2.bf16.msra.mxu1 %v3009_v50  ;;  %v3698_v49 = vld [vmem:[#allocation5 + $0xb4] ss:$8 sps:$4 sm:$0xff]   ;;  %v3701_v50 = vld [vmem:[#allocation5 + $0xb0] ss:$8 sps:$4 sm:$0xff]  }
 0x258   :  { %1441 = vmatprep.subr.bf16.mxu0 %v3014_v53  ;;  %1642 = vmatprep.subr.bf16.mxu1 %v3017_v31  ;;  %v481_v53 = vrot.slane %v3649_v43, %v480_v46  ;;  %v3705_v31 = vld [vmem:[#allocation5 + $0xa4] ss:$8 sps:$4 sm:$0xff]  }
 0x259   :  { %v3718_v43 = vld [vmem:[#allocation5 + $0x84] ss:$8 sps:$4 sm:$0xff]  }
 0x25a   :  { %v3080_v46 = vld [vmem:[#allocation11 + $0x74] ss:$8 sps:$4 sm:$0xff]  }
 0x25b   :  { %1442 = vmatpush2.bf16.msra.mxu0 %v3012_v32  ;;  %1643 = vmatpush2.bf16.msra.mxu1 %v3015_v35  ;;  %v3708_v32 = vld [vmem:[#allocation5 + $0xa0] ss:$8 sps:$4 sm:$0xff]   ;;  %v3712_v35 = vld [vmem:[#allocation5 + $0x94] ss:$8 sps:$4 sm:$0xff]  }
 0x25c   :  { %v3661_v52 = vpop.f32.mrf.mxu1  ;;  %1443 = vmatprep.subr.bf16.mxu0 %v3020_v40  ;;  %1644 = vmatprep.subr.bf16.mxu1 %v3023_v47  ;;  %v3715_v40 = vld [vmem:[#allocation5 + $0x90] ss:$8 sps:$4 sm:$0xff]  }
 0x25d   :  { %v1089_v36 = vadd.f32 %v3661_v52, %v481_v53  ;;  %v3030_v52 = vld [vmem:[#allocation10 + $0x270] ss:$8 sps:$4 sm:$0xff]   ;;  %v3086_v53 = vld [vmem:[#allocation11 + $0x54] ss:$8 sps:$4 sm:$0xff]  }
 0x25e   :  { %v1090_v30 = vpop.f32.mrf.mxu1 }
 0x25f   :  { %1444 = vmatpush2.bf16.msra.mxu0 %v3018_v48  ;;  %1645 = vmatpush2.bf16.msra.mxu1 %v3021_v51  ;;  %v1091_v1 = vadd.f32 %v1090_v30, %v485_v45  ;;  %v1099_v47 = vmax.f32 %v1089_v36, 0.0  ;;  %v3721_v48 = vld [vmem:[#allocation5 + $0x80] ss:$8 sps:$4 sm:$0xff]  }
 0x260   :  { %v1092_v33 = vpop.f32.mrf.mxu1  ;;  %1445 = vmatprep.subr.bf16.mxu0 %v3026_v37  ;;  %1646 = vmatprep.subr.bf16.mxu1 %v3029_v38  ;;  %v3032_v30 = vld [vmem:[#allocation10 + $0x274] ss:$8 sps:$4 sm:$0xff]   ;;  %v3071_v38 = vld [vmem:[#allocation10 + $0x2a4] ss:$8 sps:$4 sm:$0xff]   ;;  %v3072_v45 = vld [vmem:[#allocation10 + $0x290] ss:$8 sps:$4 sm:$0xff]  }
 0x261   :  { %v1100_v4 = vmax.f32 %v1091_v1, 0.0  ;;  %v1657_v51 = vpack.c.bf16 %v1099_v47, %v1099_v47  ;;  %v3035_v33 = vld [vmem:[#allocation10 + $0x264] ss:$8 sps:$4 sm:$0xff]   ;;  %v3038_v37 = vld [vmem:[#allocation10 + $0x254] ss:$8 sps:$4 sm:$0xff]  }
 0x262   :  { %v1093_v34 = vpop.f32.mrf.mxu1  ;;  %v3077_v1 = vld [vmem:[#allocation10 + $0x284] ss:$8 sps:$4 sm:$0xff]   ;;  %v3087_v36 = vld [vmem:[#allocation11 + $0x40] ss:$8 sps:$4 sm:$0xff]  }
 0x263   :  { %1446 = vmatpush2.bf16.msra.mxu0 %v3024_v0  ;;  %1647 = vmatpush2.bf16.msra.mxu1 %v3027_v41  ;;  %v1658_v13 = vpack.c.bf16 %v1100_v4, %v1100_v4  ;;  %v3033_v34 = vld [vmem:[#allocation10 + $0x260] ss:$8 sps:$4 sm:$0xff]   ;;  %v3066_v0 = vld [vmem:[#allocation10 + $0x2b0] ss:$8 sps:$4 sm:$0xff]   ;;  %v3095_v47 = vld [vmem:[#allocation11 + $0x24] ss:$8 sps:$4 sm:$0xff]  }
 0x264   :  { %1659 = vmatprep.subr.bf16.mxu0 %v3569_v54  ;;  %1894 = vmatprep.subr.bf16.mxu1 %v3032_v30  ;;  %v3069_v41 = vld [vmem:[#allocation10 + $0x2a0] ss:$8 sps:$4 sm:$0xff]  }
 0x265   :  { %v3099_v30 = vld [vmem:[#allocation11] ss:$8 sps:$4 sm:$0xff]  }
 0x2e6   :  { %v1137_v2 = vpop.f32.mrf.mxu0  ;;  %v1214_v3 = vpop.f32.mrf.mxu1 }
 0x2e7   :  { %v1144_v9 = vpack.c.bf16 %v1137_v2, %v1137_v2  ;;  %v1221_v10 = vpack.c.bf16 %v1214_v3, %v1214_v3  ;;  %v3075_v2 = vld [vmem:[#allocation10 + $0x280] ss:$8 sps:$4 sm:$0xff]  }
 0x2e8   :  { %v1139_v5 = vpop.f32.mrf.mxu0  ;;  %v1216_v6 = vpop.f32.mrf.mxu1 }
 0x2e9   :  { %v1145_v7 = vpack.c.bf16 %v1139_v5, %v1139_v5  ;;  %v1222_v8 = vpack.c.bf16 %v1216_v6, %v1216_v6 }
 0x2ea   :  { %v1141_v11 = vpop.f32.mrf.mxu0  ;;  %v1218_v12 = vpop.f32.mrf.mxu1 }
 0x2eb   :  { %1447 = vmatprep.mubr.bf16.mxu0 %v1222_v8  ;;  %1648 = vmatprep.mubr.bf16.mxu1 %v1145_v7 }
 0x2ec   :  { %v1142_v18 = vpop.f32.mrf.mxu0  ;;  %v1219_v21 = vpop.f32.mrf.mxu1  ;;  %1448 = vmatmul.mubr.bf16.vlgmr.msra.gmra.mxu0 %v1221_v10  ;;  %1649 = vmatmul.mubr.bf16.vlgmr.msra.gmra.mxu1 %v1144_v9 }
 0x2ed   :  { %1660 = vmatpush1.bf16.msra.mxu0 %v3574_v55  ;;  %1691 = vmatprep.mubr.bf16.mxu0 %v1658_v13 }
 0x2ee   :  { %1661 = vmatprep.subr.bf16.mxu0 %v3577_v56  ;;  %1895 = vmatpush1.bf16.msra.mxu1 %v3030_v52  ;;  %v3101_v52 = vld [vmem:[#allocation11 + $0x4] ss:$8 sps:$4 sm:$0xff]  }
 0x2ef   :  { %1896 = vmatprep.subr.bf16.mxu1 %v3035_v33  ;;  %v3104_v33 = vld [vmem:[#allocation11 + $0xf4] ss:$8 sps:$4 sm:$0xff]  }
 0x2f1   :  { %1662 = vmatpush1.bf16.msra.mxu0 %v3580_v57 }
 0x2f2   :  { %1663 = vmatprep.subr.bf16.mxu0 %v3583_v58  ;;  %1897 = vmatpush1.bf16.msra.mxu1 %v3033_v34  ;;  %v3102_v34 = vld [vmem:[#allocation11 + $0xf0] ss:$8 sps:$4 sm:$0xff]  }
 0x2f3   :  { %1898 = vmatprep.subr.bf16.mxu1 %v3038_v37  ;;  %v3107_v37 = vld [vmem:[#allocation11 + $0xe4] ss:$8 sps:$4 sm:$0xff]  }
 0x2f5   :  { %1664 = vmatpush1.bf16.msra.mxu0 %v3586_v59 }
 0x2f6   :  { %1665 = vmatprep.subr.bf16.mxu0 %v3589_v60 }
 0x2f9   :  { %1666 = vmatpush1.bf16.msra.mxu0 %v3592_v61 }
 0x2fa   :  { %1667 = vmatprep.subr.bf16.mxu0 %v3595_v62 }
 0x2fd   :  { %1668 = vmatpush1.bf16.msra.mxu0 %v3598_v63 }
 0x2fe   :  { %1669 = vmatprep.subr.bf16.mxu0 %v3601_v14 }
 0x301   :  { %1670 = vmatpush1.bf16.msra.mxu0 %v3604_v15 }
 0x302   :  { %1671 = vmatprep.subr.bf16.mxu0 %v3607_v16 }
 0x305   :  { %1672 = vmatpush1.bf16.msra.mxu0 %v3610_v17 }
 0x306   :  { %1673 = vmatprep.subr.bf16.mxu0 %v3613_v19 }
 0x309   :  { %1674 = vmatpush1.bf16.msra.mxu0 %v3616_v20 }
 0x30a   :  { %1675 = vmatprep.subr.bf16.mxu0 %v3619_v23 }
 0x30d   :  { %1676 = vmatpush2.bf16.msra.mxu0 %v3622_v25 }
 0x30e   :  { %1677 = vmatprep.subr.bf16.mxu0 %v3625_v26 }
 0x311   :  { %1678 = vmatpush2.bf16.msra.mxu0 %v3628_v29 }
 0x312   :  { %1679 = vmatprep.subr.bf16.mxu0 %v3685_v22 }
 0x315   :  { %1680 = vmatpush2.bf16.msra.mxu0 %v3688_v24 }
 0x316   :  { %1681 = vmatprep.subr.bf16.mxu0 %v3691_v27 }
 0x319   :  { %1682 = vmatpush2.bf16.msra.mxu0 %v3694_v28 }
 0x31a   :  { %1683 = vmatprep.subr.bf16.mxu0 %v3698_v49 }
 0x31d   :  { %1684 = vmatpush2.bf16.msra.mxu0 %v3701_v50 }
 0x31e   :  { %1685 = vmatprep.subr.bf16.mxu0 %v3705_v31 }
 0x321   :  { %1686 = vmatpush2.bf16.msra.mxu0 %v3708_v32 }
 0x322   :  { %1687 = vmatprep.subr.bf16.mxu0 %v3712_v35 }
 0x325   :  { %1688 = vmatpush2.bf16.msra.mxu0 %v3715_v40 }
 0x326   :  { %1689 = vmatprep.subr.bf16.mxu0 %v3718_v43 }
 0x329   :  { %1690 = vmatpush2.bf16.msra.mxu0 %v3721_v48 }
 0x32a   :  { %1955 = vmatprep.subr.bf16.mxu0 %v3569_v54  ;;  %v3036_v54 = vld [vmem:[#allocation10 + $0x250] ss:$8 sps:$4 sm:$0xff]  }
 0x32b   :  { %1899 = vmatpush1.bf16.msra.mxu1 %v3036_v54  ;;  %v3105_v54 = vld [vmem:[#allocation11 + $0xe0] ss:$8 sps:$4 sm:$0xff]  }
 0x32c   :  { %1692 = vmatmul.mubr.bf16.vlgmr.msra.gmra.mxu0 %v1657_v51  ;;  %v3096_v51 = vld [vmem:[#allocation11 + $0x10] ss:$8 sps:$4 sm:$0xff]  }
 0x32d   :  { %1956 = vmatpush1.bf16.msra.mxu0 %v3574_v55  ;;  %v3041_v55 = vld [vmem:[#allocation10 + $0x244] ss:$8 sps:$4 sm:$0xff]  }
 0x32e   :  { %1957 = vmatprep.subr.bf16.mxu0 %v3577_v56  ;;  %v3039_v56 = vld [vmem:[#allocation10 + $0x240] ss:$8 sps:$4 sm:$0xff]   ;;  %1900 = vmatprep.subr.bf16.mxu1 %v3041_v55  ;;  %v3110_v55 = vld [vmem:[#allocation11 + $0xd4] ss:$8 sps:$4 sm:$0xff]  }
 0x32f   :  { %1901 = vmatpush1.bf16.msra.mxu1 %v3039_v56  ;;  %v3108_v56 = vld [vmem:[#allocation11 + $0xd0] ss:$8 sps:$4 sm:$0xff]  }
 0x331   :  { %1958 = vmatpush1.bf16.msra.mxu0 %v3580_v57  ;;  %v3044_v57 = vld [vmem:[#allocation10 + $0x234] ss:$8 sps:$4 sm:$0xff]  }
 0x332   :  { %1959 = vmatprep.subr.bf16.mxu0 %v3583_v58  ;;  %v3042_v58 = vld [vmem:[#allocation10 + $0x230] ss:$8 sps:$4 sm:$0xff]   ;;  %1902 = vmatprep.subr.bf16.mxu1 %v3044_v57  ;;  %v3113_v57 = vld [vmem:[#allocation11 + $0xc4] ss:$8 sps:$4 sm:$0xff]  }
 0x333   :  { %1903 = vmatpush1.bf16.msra.mxu1 %v3042_v58  ;;  %v3111_v58 = vld [vmem:[#allocation11 + $0xc0] ss:$8 sps:$4 sm:$0xff]  }
 0x335   :  { %1960 = vmatpush1.bf16.msra.mxu0 %v3586_v59  ;;  %v3047_v59 = vld [vmem:[#allocation10 + $0x224] ss:$8 sps:$4 sm:$0xff]  }
 0x336   :  { %1961 = vmatprep.subr.bf16.mxu0 %v3589_v60  ;;  %v3045_v60 = vld [vmem:[#allocation10 + $0x220] ss:$8 sps:$4 sm:$0xff]   ;;  %1904 = vmatprep.subr.bf16.mxu1 %v3047_v59  ;;  %v3116_v59 = vld [vmem:[#allocation11 + $0xb4] ss:$8 sps:$4 sm:$0xff]  }
 0x337   :  { %1905 = vmatpush1.bf16.msra.mxu1 %v3045_v60  ;;  %v3114_v60 = vld [vmem:[#allocation11 + $0xb0] ss:$8 sps:$4 sm:$0xff]  }
 0x339   :  { %1962 = vmatpush1.bf16.msra.mxu0 %v3592_v61  ;;  %v3050_v61 = vld [vmem:[#allocation10 + $0x214] ss:$8 sps:$4 sm:$0xff]  }
 0x33a   :  { %1963 = vmatprep.subr.bf16.mxu0 %v3595_v62  ;;  %v3048_v62 = vld [vmem:[#allocation10 + $0x210] ss:$8 sps:$4 sm:$0xff]   ;;  %1906 = vmatprep.subr.bf16.mxu1 %v3050_v61  ;;  %v3119_v61 = vld [vmem:[#allocation11 + $0xa4] ss:$8 sps:$4 sm:$0xff]  }
 0x33b   :  { %1907 = vmatpush1.bf16.msra.mxu1 %v3048_v62  ;;  %v3117_v62 = vld [vmem:[#allocation11 + $0xa0] ss:$8 sps:$4 sm:$0xff]  }
 0x33d   :  { %1964 = vmatpush1.bf16.msra.mxu0 %v3598_v63  ;;  %v3053_v63 = vld [vmem:[#allocation10 + $0x204] ss:$8 sps:$4 sm:$0xff]  }
 0x33e   :  { %1965 = vmatprep.subr.bf16.mxu0 %v3601_v14  ;;  %v3051_v14 = vld [vmem:[#allocation10 + $0x200] ss:$8 sps:$4 sm:$0xff]   ;;  %1908 = vmatprep.subr.bf16.mxu1 %v3053_v63  ;;  %v3122_v63 = vld [vmem:[#allocation11 + $0x94] ss:$8 sps:$4 sm:$0xff]  }
 0x33f   :  { %1909 = vmatpush1.bf16.msra.mxu1 %v3051_v14  ;;  %v3120_v14 = vld [vmem:[#allocation11 + $0x90] ss:$8 sps:$4 sm:$0xff]  }
 0x341   :  { %1966 = vmatpush1.bf16.msra.mxu0 %v3604_v15  ;;  %v3056_v15 = vld [vmem:[#allocation10 + $0x2f4] ss:$8 sps:$4 sm:$0xff]  }
 0x342   :  { %1967 = vmatprep.subr.bf16.mxu0 %v3607_v16  ;;  %v3054_v16 = vld [vmem:[#allocation10 + $0x2f0] ss:$8 sps:$4 sm:$0xff]   ;;  %1910 = vmatprep.subr.bf16.mxu1 %v3056_v15  ;;  %v1937_v15 = vld [vmem:[%s3780_s5] sm:$0x3] }
 0x343   :  { %1911 = vmatpush2.bf16.msra.mxu1 %v3054_v16  ;;  %v1942_v16 = vrot.slane %v1937_v15, %v3646_v39 }
 0x345   :  { %1968 = vmatpush1.bf16.msra.mxu0 %v3610_v17  ;;  %v3059_v17 = vld [vmem:[#allocation10 + $0x2e4] ss:$8 sps:$4 sm:$0xff]  }
 0x346   :  { %1969 = vmatprep.subr.bf16.mxu0 %v3613_v19  ;;  %v3057_v19 = vld [vmem:[#allocation10 + $0x2e0] ss:$8 sps:$4 sm:$0xff]   ;;  %1912 = vmatprep.subr.bf16.mxu1 %v3059_v17 }
 0x347   :  { %1913 = vmatpush2.bf16.msra.mxu1 %v3057_v19 }
 0x349   :  { %1970 = vmatpush1.bf16.msra.mxu0 %v3616_v20  ;;  %v3062_v20 = vld [vmem:[#allocation10 + $0x2d4] ss:$8 sps:$4 sm:$0xff]  }
 0x34a   :  { %1971 = vmatprep.subr.bf16.mxu0 %v3619_v23  ;;  %v3060_v23 = vld [vmem:[#allocation10 + $0x2d0] ss:$8 sps:$4 sm:$0xff]   ;;  %1914 = vmatprep.subr.bf16.mxu1 %v3062_v20  ;;  %v1946_v20 = vrot.slane %v1937_v15, %v3652_v44 }
 0x34b   :  { %1915 = vmatpush2.bf16.msra.mxu1 %v3060_v23 }
 0x34d   :  { %1972 = vmatpush2.bf16.msra.mxu0 %v3622_v25  ;;  %v3065_v25 = vld [vmem:[#allocation10 + $0x2c4] ss:$8 sps:$4 sm:$0xff]  }
 0x34e   :  { %1973 = vmatprep.subr.bf16.mxu0 %v3625_v26  ;;  %v3063_v26 = vld [vmem:[#allocation10 + $0x2c0] ss:$8 sps:$4 sm:$0xff]   ;;  %1916 = vmatprep.subr.bf16.mxu1 %v3065_v25 }
 0x34f   :  { %1917 = vmatpush2.bf16.msra.mxu1 %v3063_v26 }
 0x351   :  { %1974 = vmatpush2.bf16.msra.mxu0 %v3628_v29  ;;  %v3068_v29 = vld [vmem:[#allocation10 + $0x2b4] ss:$8 sps:$4 sm:$0xff]  }
 0x352   :  { %1975 = vmatprep.subr.bf16.mxu0 %v3685_v22  ;;  %1918 = vmatprep.subr.bf16.mxu1 %v3068_v29 }
 0x353   :  { %1919 = vmatpush2.bf16.msra.mxu1 %v3066_v0 }
 0x354   :  { %1920 = vmatprep.subr.bf16.mxu1 %v3071_v38 }
 0x355   :  { %1976 = vmatpush2.bf16.msra.mxu0 %v3688_v24 }
 0x356   :  { %1977 = vmatprep.subr.bf16.mxu0 %v3691_v27 }
 0x357   :  { %1921 = vmatpush2.bf16.msra.mxu1 %v3069_v41 }
 0x358   :  { %1922 = vmatprep.subr.bf16.mxu1 %v3074_v42 }
 0x359   :  { %1978 = vmatpush2.bf16.msra.mxu0 %v3694_v28  ;;  %v3078_v28 = vld [vmem:[#allocation11 + $0x70] ss:$8 sps:$4 sm:$0xff]  }
 0x35a   :  { %1979 = vmatprep.subr.bf16.mxu0 %v3698_v49  ;;  %v3083_v49 = vld [vmem:[#allocation11 + $0x64] ss:$8 sps:$4 sm:$0xff]  }
 0x35b   :  { %1923 = vmatpush2.bf16.msra.mxu1 %v3072_v45 }
 0x35c   :  { %1924 = vmatprep.subr.bf16.mxu1 %v3077_v1 }
 0x35d   :  { %1980 = vmatpush2.bf16.msra.mxu0 %v3701_v50  ;;  %v3081_v50 = vld [vmem:[#allocation11 + $0x60] ss:$8 sps:$4 sm:$0xff]  }
 0x35e   :  { %1981 = vmatprep.subr.bf16.mxu0 %v3705_v31  ;;  %v3084_v31 = vld [vmem:[#allocation11 + $0x50] ss:$8 sps:$4 sm:$0xff]  }
 0x35f   :  { %1925 = vmatpush2.bf16.msra.mxu1 %v3075_v2  ;;  %v3125_v2 = vld [vmem:[#allocation11 + $0x84] ss:$8 sps:$4 sm:$0xff]  }
 0x360   :  { %2202 = vmatprep.subr.bf16.mxu1 %v3080_v46 }
 0x361   :  { %1982 = vmatpush2.bf16.msra.mxu0 %v3708_v32  ;;  %v3089_v32 = vld [vmem:[#allocation11 + $0x44] ss:$8 sps:$4 sm:$0xff]  }
 0x362   :  { %1983 = vmatprep.subr.bf16.mxu0 %v3712_v35  ;;  %v3092_v35 = vld [vmem:[#allocation11 + $0x34] ss:$8 sps:$4 sm:$0xff]  }
 0x365   :  { %1984 = vmatpush2.bf16.msra.mxu0 %v3715_v40  ;;  %v3090_v40 = vld [vmem:[#allocation11 + $0x30] ss:$8 sps:$4 sm:$0xff]  }
 0x366   :  { %1985 = vmatprep.subr.bf16.mxu0 %v3718_v43  ;;  %v3093_v43 = vld [vmem:[#allocation11 + $0x20] ss:$8 sps:$4 sm:$0xff]  }
 0x369   :  { %1986 = vmatpush2.bf16.msra.mxu0 %v3721_v48  ;;  %v3098_v48 = vld [vmem:[#allocation11 + $0x14] ss:$8 sps:$4 sm:$0xff]  }
 0x3ac   :  { %v1449_v3 = vpop.f32.mrf.mxu0  ;;  %v1650_v4 = vpop.f32.mrf.mxu1 }
 0x3ad   :  { %v3756_v5 = vadd.f32 %v1650_v4, %v1449_v3  ;;  %v3123_v3 = vld [vmem:[#allocation11 + $0x80] ss:$8 sps:$4 sm:$0xff]   ;;  %v3126_v4 = vld [vmem:[#allocation13 + $0x78] sm:$0xff]  }
 0x3ae   :  { %v1451_v6 = vpop.f32.mrf.mxu0  ;;  %v1652_v7 = vpop.f32.mrf.mxu1  ;;  %2706 = vmatprep.subr.bf16.mxu0 %v3126_v4 }
 0x3af   :  { %v3758_v8 = vadd.f32 %v1652_v7, %v1451_v6  ;;  %v3128_v6 = vld [vmem:[#allocation13 + $0x70] sm:$0xff]  }
 0x3b0   :  { %v1453_v9 = vpop.f32.mrf.mxu0  ;;  %v1654_v10 = vpop.f32.mrf.mxu1  ;;  %v3129_v7 = vld [vmem:[#allocation13 + $0x30] sm:$0xff]  }
 0x3b1   :  { %v3131_v9 = vld [vmem:[#allocation13 + $0x28] sm:$0xff]   ;;  %v3132_v10 = vld [vmem:[#allocation13 + $0x60] sm:$0xff]  }
 0x3b2   :  { %v1454_v11 = vpop.f32.mrf.mxu0  ;;  %v1655_v12 = vpop.f32.mrf.mxu1 }
 0x3b3   :  { %v3133_v11 = vld [vmem:[#allocation13 + $0x20] sm:$0xff]   ;;  %v3134_v12 = vld [vmem:[#allocation13 + $0x58] sm:$0xff]  }
 0x3ec   :  { %v1693_v13 = vpop.f32.mrf.mxu0 }
 0x3ed   :  { %v1700_v22 = vpack.c.bf16 %v1693_v13, %v1693_v13  ;;  %v3135_v13 = vld [vmem:[#allocation13 + $0x18] sm:$0xff]  }
 0x3ee   :  { %v1695_v18 = vpop.f32.mrf.mxu0 }
 0x3ef   :  { %v1701_v21 = vpack.c.bf16 %v1695_v18, %v1695_v18  ;;  %v3136_v18 = vld [vmem:[#allocation13 + $0x50] sm:$0xff]  }
 0x3f0   :  { %v1697_v24 = vpop.f32.mrf.mxu0 }
 0x3f1   :  { %1926 = vmatprep.mubr.bf16.mxu1 %v1701_v21  ;;  %v3137_v21 = vld [vmem:[#allocation13 + $0x10] sm:$0xff]  }
 0x3f2   :  { %v1698_v27 = vpop.f32.mrf.mxu0  ;;  %1927 = vmatmul.mubr.bf16.vlgmr.msra.gmra.mxu1 %v1700_v22 }
 0x3f3   :  { %2203 = vmatpush1.bf16.msra.mxu1 %v3078_v28 }
 0x3f4   :  { %2204 = vmatprep.subr.bf16.mxu1 %v3083_v49 }
 0x3f7   :  { %2205 = vmatpush1.bf16.msra.mxu1 %v3081_v50  ;;  %v3138_v50 = vld [vmem:[#allocation13 + $0x48] sm:$0xff]  }
 0x3f8   :  { %2206 = vmatprep.subr.bf16.mxu1 %v3086_v53  ;;  %v3139_v53 = vld [vmem:[#allocation13 + $0x8] sm:$0xff]  }
 0x3fb   :  { %2207 = vmatpush1.bf16.msra.mxu1 %v3084_v31  ;;  %v3140_v31 = vld [vmem:[#allocation13 + $0x40] sm:$0xff]  }
 0x3fc   :  { %2208 = vmatprep.subr.bf16.mxu1 %v3089_v32  ;;  %v3141_v32 = vld [vmem:[#allocation13] sm:$0xff]  }
 0x3ff   :  { %2209 = vmatpush1.bf16.msra.mxu1 %v3087_v36  ;;  %v2030_v36 = vld [vmem:[%s3782_s7] sm:$0x3]  ;;  %s3314_s7 = scalar_lea.vmem %s2423_s25, 128 }
 0x400   :  { %2210 = vmatprep.subr.bf16.mxu1 %v3092_v35  ;;  %v2035_v35 = vrot.slane %v2030_v36, %v3646_v39  ;;  %p3315_p7 = scmp.ne.s32.totalorder %s2423_s25, %s3314_s7  ;;  %p3320_p9 = scmp.lt.s32.totalorder %s3314_s7, %s3314_s7 }
 0x402   :  { %p3321_p10 = por %p3320_p9, %p3319_p8 }
 0x403   :  { %2211 = vmatpush1.bf16.msra.mxu1 %v3090_v40  ;;  %v2039_v40 = vrot.slane %v2030_v36, %v3652_v44 }
 0x404   :  { %2212 = vmatprep.subr.bf16.mxu1 %v3095_v47  ;;  %p3322_p11 = pnand %p3321_p10, %p3315_p7 }
 0x407   :  { %2213 = vmatpush1.bf16.msra.mxu1 %v3093_v43 }
 0x408   :  { %2214 = vmatprep.subr.bf16.mxu1 %v3098_v48 }
 0x40b   :  { %2215 = vmatpush1.bf16.msra.mxu1 %v3096_v51 }
 0x40c   :  { %2216 = vmatprep.subr.bf16.mxu1 %v3101_v52 }
 0x40f   :  { %2217 = vmatpush1.bf16.msra.mxu1 %v3099_v30 }
 0x410   :  { %2218 = vmatprep.subr.bf16.mxu1 %v3104_v33 }
 0x413   :  { %2219 = vmatpush2.bf16.msra.mxu1 %v3102_v34 }
 0x414   :  { %2220 = vmatprep.subr.bf16.mxu1 %v3107_v37 }
 0x417   :  { %2221 = vmatpush2.bf16.msra.mxu1 %v3105_v54 }
 0x418   :  { %2222 = vmatprep.subr.bf16.mxu1 %v3110_v55 }
 0x41b   :  { %2223 = vmatpush2.bf16.msra.mxu1 %v3108_v56 }
 0x41c   :  { %2224 = vmatprep.subr.bf16.mxu1 %v3113_v57 }
 0x41f   :  { %2225 = vmatpush2.bf16.msra.mxu1 %v3111_v58 }
 0x420   :  { %2226 = vmatprep.subr.bf16.mxu1 %v3116_v59 }
 0x423   :  { %2227 = vmatpush2.bf16.msra.mxu1 %v3114_v60 }
 0x424   :  { %2228 = vmatprep.subr.bf16.mxu1 %v3119_v61 }
 0x427   :  { %2229 = vmatpush2.bf16.msra.mxu1 %v3117_v62 }
 0x428   :  { %2230 = vmatprep.subr.bf16.mxu1 %v3122_v63 }
 0x42b   :  { %2231 = vmatpush2.bf16.msra.mxu1 %v3120_v14 }
 0x42c   :  { %2232 = vmatprep.subr.bf16.mxu1 %v3125_v2 }
 0x42f   :  { %2233 = vmatpush2.bf16.msra.mxu1 %v3123_v3 }
 0x4b2   :  { %v1928_v17 = vpop.f32.mrf.mxu1 }
 0x4b3   :  { %v1935_v19 = vadd.f32 %v1928_v17, %v3756_v5  ;;  %v3127_v5 = vld [vmem:[#allocation13 + $0x38] sm:$0xff]  }
 0x4b4   :  { %v1930_v23 = vpop.f32.mrf.mxu1 }
 0x4b5   :  { %v1949_v25 = vadd.f32 %v1942_v16, %v1935_v19  ;;  %v1936_v26 = vadd.f32 %v1930_v23, %v3758_v8  ;;  %v3130_v8 = vld [vmem:[#allocation13 + $0x68] sm:$0xff]  }
 0x4b6   :  { %v1932_v29 = vpop.f32.mrf.mxu1 }
 0x4b7   :  { %v1950_v0 = vadd.f32 %v1946_v20, %v1936_v26  ;;  %v1951_v38 = vmax.f32 %v1949_v25, 0.0 }
 0x4b8   :  { %v1933_v41 = vpop.f32.mrf.mxu1 }
 0x4b9   :  { %v1952_v42 = vmax.f32 %v1950_v0, 0.0  ;;  %v1953_v1 = vpack.c.bf16 %v1951_v38, %v1951_v38 }
 0x4bb   :  { %v1954_v45 = vpack.c.bf16 %v1952_v42, %v1952_v42 }
 0x4bd   :  { %1987 = vmatprep.mubr.bf16.mxu0 %v1954_v45 }
 0x4be   :  { %1988 = vmatmul.mubr.bf16.vlgmr.msra.gmra.mxu0 %v1953_v1 }
 0x4bf   :  { %2707 = vmatpush3.bf16.msra.mxu0 %v3127_v5 }
 0x4c0   :  { %2708 = vmatprep.subr.bf16.mxu0 %v3128_v6 }
 0x4c3   :  { %2709 = vmatpush3.bf16.msra.mxu0 %v3129_v7 }
 0x4c4   :  { %2710 = vmatprep.subr.bf16.mxu0 %v3130_v8 }
 0x4c7   :  { %2711 = vmatpush3.bf16.msra.mxu0 %v3131_v9 }
 0x4c8   :  { %2712 = vmatprep.subr.bf16.mxu0 %v3132_v10 }
 0x4cb   :  { %2713 = vmatpush3.bf16.msra.mxu0 %v3133_v11 }
 0x4cc   :  { %2714 = vmatprep.subr.bf16.mxu0 %v3134_v12 }
 0x4cf   :  { %2715 = vmatpush3.bf16.msra.mxu0 %v3135_v13 }
 0x4d0   :  { %2716 = vmatprep.subr.bf16.mxu0 %v3136_v18 }
 0x4d3   :  { %2717 = vmatpush3.bf16.msra.mxu0 %v3137_v21 }
 0x4d4   :  { %2718 = vmatprep.subr.bf16.mxu0 %v3138_v50 }
 0x4d7   :  { %2719 = vmatpush3.bf16.msra.mxu0 %v3139_v53 }
 0x4d8   :  { %2720 = vmatprep.subr.bf16.mxu0 %v3140_v31 }
 0x4db   :  { %2721 = vmatpush3.bf16.msra.mxu0 %v3141_v32 }
 0x57e   :  { %v1989_v22 = vpop.f32.mrf.mxu0 }
 0x57f   :  { %v1996_v28 = vpack.c.bf16 %v1989_v22, %v1989_v22 }
 0x580   :  { %v1991_v24 = vpop.f32.mrf.mxu0 }
 0x581   :  { %v1997_v27 = vpack.c.bf16 %v1991_v24, %v1991_v24 }
 0x582   :  { %v1993_v46 = vpop.f32.mrf.mxu0 }
 0x583   :  { %2234 = vmatprep.mubr.bf16.mxu1 %v1997_v27 }
 0x584   :  { %v1994_v49 = vpop.f32.mrf.mxu0  ;;  %2235 = vmatmul.mubr.bf16.vlgmr.msra.gmra.mxu1 %v1996_v28 }
 0x644   :  { %v2236_v47 = vpop.f32.mrf.mxu1 }
 0x645   :  { %v2237_v43 = vadd.f32 %v2236_v47, %v2035_v35 }
 0x646   :  { %v2238_v48 = vpop.f32.mrf.mxu1 }
 0x647   :  { %v2239_v51 = vadd.f32 %v2238_v48, %v2039_v40  ;;  %v2243_v52 = vmax.f32 %v2237_v43, 0.0 }
 0x648   :  { %v2240_v30 = vpop.f32.mrf.mxu1 }
 0x649   :  { %v2244_v33 = vmax.f32 %v2239_v51, 0.0  ;;  %v2245_v54 = vpack.c.bf16 %v2243_v52, %v2243_v52 }
 0x64a   :  { %v2241_v34 = vpop.f32.mrf.mxu1 }
 0x64b   :  { %v2246_v37 = vpack.c.bf16 %v2244_v33, %v2244_v33 }
 0x64d   :  { %2407 = vmatprep.mubr.bf16.mxu0 %v2246_v37 }
 0x64e   :  { %2408 = vmatmul.mubr.bf16.vlgmr.msra.gmra.mxu0 %v2245_v54 }
 0x70e   :  { %v2722_v55 = vpop.f32.mrf.mxu0 }
 0x710   :  { %v2723_v56 = vpop.f32.mrf.mxu0 }
 0x711   :  { %v2724_v57 = vadd.f32 %v2723_v56, %v2722_v55 }
 0x712   :  { %v2725_v39 = vpop.f32.mrf.mxu0 }
 0x713   :  { %2415 = vst [vmem:[#allocation14] sm:$0xff] %v2724_v57 }
 0x714   :  { %v2726_v44 = vpop.f32.mrf.mxu0 }
 0x715   :  { %3325 = shalt.err (!%p3322_p11)
}
 0x716   :  { %2425 = dma.vmem_to_hbm [thread:$0]  %s2423_s25, 128, %s3784_s9, [#allocation4]  }
 0x717   :  { %3342 = dma.done.wait [#allocation4], 128  }
 0x718   :  { %3343 = vsyncadd [#allocation4], 4294967168 }
 0x719   :  { %2429 = vsyncpa [#allocation3], 1 }
 0x71a   :  { %2430 = vsyncpa [#allocation6], 1 }
 0x71b   :  { %2431 = vsyncpa [#allocation9], 1 }
 0x71c   :  { %2432 = vsyncpa [#allocation12], 1 }
 0x71d   :  { %2433 = vsyncpa [#allocation4], 1 }

</bundles_post_ra>
